<compile_context>
chip_gen: v7x
topology: tpu7x:2x2x1
jax: 0.10.0
libtpu: 0.0.40
codegen_flags: <defaults>
</compile_context>

<pallas_src>
import jax
import jax.numpy as jnp
from jax import lax
from jax.experimental import pallas as pl
from jax.experimental.pallas import tpu as pltpu

# ---- "config" values (synthetic, deterministic) ----
TYPE = "LSTM"
NUM_LAYERS = 1
BIDIRECTIONAL = False
HIDDEN_DIM = 32
EMBED_DIM = 16
OUTPUT_DIM = 20          # vocab size
MAX_LENGTH = 8
START_TOKEN = 1          # dataset.start
BATCH = 2
SEQ_ENC = 8

V_PAD = 128              # lane-dense padded vocab (multiple of 128)
NEG_INF = -1e30


def _decoder_kernel(emb_ih_ref, w_comb_ref, b_comb_ref, h0_ref, c0_ref,
                    logits_ref, hT_ref):
    B, H = h0_ref.shape
    Vp = emb_ih_ref.shape[0]
    G = 4 * H
    T = logits_ref.shape[1]
    iota_v = lax.broadcasted_iota(jnp.int32, (B, Vp), 1)

    # invariant operands (loaded once)
    emb_ih = emb_ih_ref[...]        # (Vp, 4H)     relu(emb) @ W_ih, zero-padded rows
    w_comb = w_comb_ref[...]        # (H, 4H+Vp)   [W_hh | W_out_pad]
    b_comb = b_comb_ref[...]        # (1, 4H+Vp)   [b_ih+b_hh | b_out_pad (-1e30 pad)]

    # carried state
    h = h0_ref[...]
    c = c0_ref[...]
    onehot = (iota_v == START_TOKEN).astype(jnp.float32)   # (B, Vp)

    # Pre-loop recurrent/output projection of the encoder hidden state.
    # Only the gate half is consumed; the logits half is never emitted.
    hproj = jnp.dot(h, w_comb, preferred_element_type=jnp.float32) + b_comb

    # fully-unrolled autoregressive decode (T is a compile-time constant)
    for t in range(T):
        # gate pre-activations: carried h-projection + one-hot "embedding" row
        gates = hproj[:, :G] + jnp.dot(onehot, emb_ih,
                                       preferred_element_type=jnp.float32)

        sig = jax.nn.sigmoid(gates)              # one EUP pass over the vreg
        i_g = sig[:, 0 * H:1 * H]
        f_g = sig[:, 1 * H:2 * H]
        g_g = jnp.tanh(gates[:, 2 * H:3 * H])    # tanh only on the g chunk
        o_g = sig[:, 3 * H:4 * H]

        c = f_g * c + i_g * g_g
        h = o_g * jnp.tanh(c)

        # one fused matmul: (next-step recurrent proj | output logits)
        hproj = jnp.dot(h, w_comb, preferred_element_type=jnp.float32) + b_comb
        logits = hproj[:, G:]                    # (B, Vp), padded lanes = -1e30

        # batch-first write of this step's logits into the VMEM output slab
        logits_ref[:, t, :] = logits

        # greedy argmax (first max index, like torch.topk) -> next one-hot
        mx = jnp.max(logits, axis=-1, keepdims=True)
        idx = jnp.min(jnp.where(logits == mx, iota_v, Vp), axis=-1, keepdims=True)
        onehot = (iota_v == idx).astype(jnp.float32)

    # final hidden state written once, after the loop
    hT_ref[...] = h


def decoder_forward(params, encoder_outputs, encoder_hidden, max_length=MAX_LENGTH):
    emb, w_ih, w_hh, b, w_out, b_out = params
    h_enc, c_enc = encoder_hidden          # each (num_layers, B, H)
    B = encoder_outputs.shape[0]
    H, V, Vp = HIDDEN_DIM, OUTPUT_DIM, V_PAD
    h0 = h_enc[0]
    c0 = c_enc[0]

    # ---- offline parameter prep (one-time algebra, outside the kernel) ----
    # relu commutes with one-hot row selection => fold embedding+relu+W_ih.
    emb_ih = jnp.maximum(emb, 0.0) @ w_ih                             # (V, 4H)
    emb_ih_pad = jnp.zeros((Vp, 4 * H), jnp.float32).at[:V].set(emb_ih)
    # lane-dense output projection: pad vocab, padded logits forced to -1e30
    w_out_pad = jnp.zeros((H, Vp), jnp.float32).at[:, :V].set(w_out)
    b_out_pad = jnp.full((1, Vp), NEG_INF, jnp.float32).at[:, :V].set(b_out)
    # fuse recurrent and output projections into a single weight / bias
    w_comb = jnp.concatenate([w_hh, w_out_pad], axis=1)               # (H, 4H+Vp)
    b_comb = jnp.concatenate([b, b_out_pad], axis=1)                  # (1, 4H+Vp)

    def full(shape):
        n = len(shape)
        return pl.BlockSpec(shape, lambda i, n=n: (0,) * n)

    logits_btv, h_t = pl.pallas_call(
        _decoder_kernel,
        out_shape=(
            jax.ShapeDtypeStruct((B, max_length, Vp), jnp.float32),
            jax.ShapeDtypeStruct((B, H), jnp.float32),
        ),
        grid_spec=pltpu.PrefetchScalarGridSpec(
            num_scalar_prefetch=0,
            grid=(1,),
            in_specs=[
                full((Vp, 4 * H)),         # relu(emb) @ W_ih (vocab-padded)
                full((H, 4 * H + Vp)),     # [W_hh | W_out_pad]
                full((1, 4 * H + Vp)),     # [b_ih + b_hh | b_out_pad]
                full((B, H)),              # h0
                full((B, H)),              # c0
            ],
            out_specs=[
                full((B, max_length, Vp)),
                full((B, H)),
            ],
        ),
        compiler_params=pltpu.CompilerParams(
            dimension_semantics=("arbitrary",)),
    )(emb_ih_pad, w_comb, b_comb, h0, c0)

    decoder_outputs = logits_btv[:, :, :V]   # (B, T, V) batch_first
    decoder_hidden = h_t[None]               # (1, B, H)
    return decoder_outputs, decoder_hidden


def init_params(key):
    kE, k1, k2, k3, k4, k5, k6 = jax.random.split(key, 7)
    H, E, V = HIDDEN_DIM, EMBED_DIM, OUTPUT_DIM
    s = 1.0 / jnp.sqrt(H)
    emb = jax.random.normal(kE, (V, E), jnp.float32)                       # nn.Embedding
    w_ih = jax.random.uniform(k1, (E, 4 * H), jnp.float32, -s, s)          # LSTM W_ih^T
    w_hh = jax.random.uniform(k2, (H, 4 * H), jnp.float32, -s, s)          # LSTM W_hh^T
    b = (jax.random.uniform(k3, (1, 4 * H), jnp.float32, -s, s)
         + jax.random.uniform(k4, (1, 4 * H), jnp.float32, -s, s))         # b_ih + b_hh
    w_out = jax.random.uniform(k5, (H, V), jnp.float32, -s, s)             # Linear W^T
    b_out = jax.random.uniform(k6, (1, V), jnp.float32, -s, s)
    return emb, w_ih, w_hh, b, w_out, b_out


def reference_forward(params, encoder_outputs, encoder_hidden):
    """Pure-JAX reference matching torch semantics (greedy decode)."""
    emb, w_ih, w_hh, b, w_out, b_out = params
    h, c = encoder_hidden[0][0], encoder_hidden[1][0]
    B = encoder_outputs.shape[0]
    H = HIDDEN_DIM
    ids = jnp.full((B,), START_TOKEN, jnp.int32)
    outs = []
    for _ in range(MAX_LENGTH):
        x = jnp.maximum(emb[ids], 0.0)
        gates = x @ w_ih + h @ w_hh + b
        i_g = jax.nn.sigmoid(gates[:, 0 * H:1 * H])
        f_g = jax.nn.sigmoid(gates[:, 1 * H:2 * H])
        g_g = jnp.tanh(gates[:, 2 * H:3 * H])
        o_g = jax.nn.sigmoid(gates[:, 3 * H:4 * H])
        c = f_g * c + i_g * g_g
        h = o_g * jnp.tanh(c)
        logits = h @ w_out + b_out
        outs.append(logits)
        ids = jnp.argmax(logits, axis=-1).astype(jnp.int32)
    return jnp.stack(outs, axis=1), h[None]


if __name__ == "__main__":
    key = jax.random.PRNGKey(0)
    kp, kh, kc, ko = jax.random.split(key, 4)
    params = init_params(kp)

    encoder_outputs = jax.random.normal(ko, (BATCH, SEQ_ENC, HIDDEN_DIM), jnp.float32)
    enc_h = jax.random.normal(kh, (NUM_LAYERS, BATCH, HIDDEN_DIM), jnp.float32)
    enc_c = jax.random.normal(kc, (NUM_LAYERS, BATCH, HIDDEN_DIM), jnp.float32)

    outs, hidden = decoder_forward(params, encoder_outputs, (enc_h, enc_c))
    outs = jax.block_until_ready(outs)
    hidden = jax.block_until_ready(hidden)

    ref_outs, ref_hidden = reference_forward(params, encoder_outputs, (enc_h, enc_c))
    assert outs.shape == (BATCH, MAX_LENGTH, OUTPUT_DIM)
    assert hidden.shape == (NUM_LAYERS, BATCH, HIDDEN_DIM)
    assert jnp.allclose(outs, ref_outs, rtol=1e-4, atol=1e-4)
    assert jnp.allclose(hidden, ref_hidden, rtol=1e-4, atol=1e-4)

    print("KERNEL_OK")
</pallas_src>

<mosaic_0001>
module attributes {stable_mosaic.version = 11 : i64} {
  func.func @_decoder_kernel(%arg0: i32, %arg1: memref<128x128xf32, #tpu.memory_space<vmem>>, %arg2: memref<32x256xf32, #tpu.memory_space<vmem>>, %arg3: memref<1x256xf32, #tpu.memory_space<vmem>>, %arg4: memref<2x32xf32, #tpu.memory_space<vmem>>, %arg5: memref<2x32xf32, #tpu.memory_space<vmem>>, %arg6: memref<2x8x128xf32, #tpu.memory_space<vmem>>, %arg7: memref<2x32xf32, #tpu.memory_space<vmem>>) attributes {dimension_semantics = [#tpu.dimension_semantics<arbitrary>], iteration_bounds = array<i64: 1>, scalar_prefetch = 0 : i64, scratch_operands = 0 : i64, tpu.core_type = #tpu.core_type<tc>, window_params = [{pipeline_mode = #tpu.pipeline_mode<synchronous>, transform_indices = @transform_0, window_bounds = array<i64: 128, 128>}, {pipeline_mode = #tpu.pipeline_mode<synchronous>, transform_indices = @transform_1, window_bounds = array<i64: 32, 256>}, {pipeline_mode = #tpu.pipeline_mode<synchronous>, transform_indices = @transform_2, window_bounds = array<i64: 1, 256>}, {pipeline_mode = #tpu.pipeline_mode<synchronous>, transform_indices = @transform_3, window_bounds = array<i64: 2, 32>}, {pipeline_mode = #tpu.pipeline_mode<synchronous>, transform_indices = @transform_4, window_bounds = array<i64: 2, 32>}, {pipeline_mode = #tpu.pipeline_mode<synchronous>, transform_indices = @transform_5, window_bounds = array<i64: 2, 8, 128>}, {pipeline_mode = #tpu.pipeline_mode<synchronous>, transform_indices = @transform_6, window_bounds = array<i64: 2, 32>}]} {
    %0 = tpu.iota {dimensions = array<i32: 1>} : vector<2x128xi32>
    %c0 = arith.constant 0 : index
    %c0_0 = arith.constant 0 : index
    %1 = vector.load %arg1[%c0, %c0_0] : memref<128x128xf32, #tpu.memory_space<vmem>>, vector<128x128xf32>
    %c0_1 = arith.constant 0 : index
    %c0_2 = arith.constant 0 : index
    %2 = vector.load %arg2[%c0_1, %c0_2] : memref<32x256xf32, #tpu.memory_space<vmem>>, vector<32x256xf32>
    %c0_3 = arith.constant 0 : index
    %c0_4 = arith.constant 0 : index
    %3 = vector.load %arg3[%c0_3, %c0_4] : memref<1x256xf32, #tpu.memory_space<vmem>>, vector<1x256xf32>
    %c0_5 = arith.constant 0 : index
    %c0_6 = arith.constant 0 : index
    %4 = vector.load %arg4[%c0_5, %c0_6] : memref<2x32xf32, #tpu.memory_space<vmem>>, vector<2x32xf32>
    %c0_7 = arith.constant 0 : index
    %c0_8 = arith.constant 0 : index
    %5 = vector.load %arg5[%c0_7, %c0_8] : memref<2x32xf32, #tpu.memory_space<vmem>>, vector<2x32xf32>
    %c1_i32 = arith.constant 1 : i32
    %6 = vector.broadcast %c1_i32 : i32 to vector<2x128xi32>
    %7 = arith.cmpi eq, %0, %6 : vector<2x128xi32>
    %8 = arith.extui %7 : vector<2x128xi1> to vector<2x128xi32>
    %9 = arith.sitofp %8 : vector<2x128xi32> to vector<2x128xf32>
    %cst = arith.constant dense<0.000000e+00> : vector<2x256xf32>
    %10 = tpu.matmul %4, %2, %cst {dimension_numbers = #tpu.dot_dimension_numbers<[1], [0], [0], [1], [0, 0, 1, 1], [], []>} : vector<2x32xf32>, vector<32x256xf32>, vector<2x256xf32> -> vector<2x256xf32>
    %11 = vector.broadcast %3 : vector<1x256xf32> to vector<2x256xf32>
    %12 = arith.addf %10, %11 : vector<2x256xf32>
    %13 = vector.extract_strided_slice %12 {offsets = [0, 0], sizes = [2, 128], strides = [1, 1]} : vector<2x256xf32> to vector<2x128xf32>
    %cst_9 = arith.constant dense<0.000000e+00> : vector<2x128xf32>
    %14 = tpu.matmul %9, %1, %cst_9 {dimension_numbers = #tpu.dot_dimension_numbers<[1], [0], [0], [1], [0, 0, 1, 1], [], []>} : vector<2x128xf32>, vector<128x128xf32>, vector<2x128xf32> -> vector<2x128xf32>
    %15 = arith.addf %13, %14 : vector<2x128xf32>
    %16 = arith.negf %15 : vector<2x128xf32>
    %17 = math.exp %16 : vector<2x128xf32>
    %cst_10 = arith.constant 1.000000e+00 : f32
    %18 = vector.broadcast %cst_10 : f32 to vector<2x128xf32>
    %19 = arith.addf %18, %17 : vector<2x128xf32>
    %20 = arith.divf %18, %19 : vector<2x128xf32>
    %21 = vector.extract_strided_slice %20 {offsets = [0, 0], sizes = [2, 32], strides = [1, 1]} : vector<2x128xf32> to vector<2x32xf32>
    %22 = vector.extract_strided_slice %20 {offsets = [0, 32], sizes = [2, 32], strides = [1, 1]} : vector<2x128xf32> to vector<2x32xf32>
    %23 = vector.extract_strided_slice %15 {offsets = [0, 64], sizes = [2, 32], strides = [1, 1]} : vector<2x128xf32> to vector<2x32xf32>
    %24 = math.tanh %23 : vector<2x32xf32>
    %25 = vector.extract_strided_slice %20 {offsets = [0, 96], sizes = [2, 32], strides = [1, 1]} : vector<2x128xf32> to vector<2x32xf32>
    %26 = arith.mulf %22, %5 : vector<2x32xf32>
    %27 = arith.mulf %21, %24 : vector<2x32xf32>
    %28 = arith.addf %26, %27 : vector<2x32xf32>
    %29 = math.tanh %28 : vector<2x32xf32>
    %30 = arith.mulf %25, %29 : vector<2x32xf32>
    %cst_11 = arith.constant dense<0.000000e+00> : vector<2x256xf32>
    %31 = tpu.matmul %30, %2, %cst_11 {dimension_numbers = #tpu.dot_dimension_numbers<[1], [0], [0], [1], [0, 0, 1, 1], [], []>} : vector<2x32xf32>, vector<32x256xf32>, vector<2x256xf32> -> vector<2x256xf32>
    %32 = vector.broadcast %3 : vector<1x256xf32> to vector<2x256xf32>
    %33 = arith.addf %31, %32 : vector<2x256xf32>
    %34 = vector.extract_strided_slice %33 {offsets = [0, 128], sizes = [2, 128], strides = [1, 1]} : vector<2x256xf32> to vector<2x128xf32>
    %c0_12 = arith.constant 0 : index
    %c0_13 = arith.constant 0 : index
    %c0_14 = arith.constant 0 : index
    %35 = vector.load %arg6[%c0_12, %c0_13, %c0_14] : memref<2x8x128xf32, #tpu.memory_space<vmem>>, vector<2x1x128xf32>
    %36 = vector.shape_cast %35 : vector<2x1x128xf32> to vector<2x128xf32>
    %37 = vector.shape_cast %34 : vector<2x128xf32> to vector<2x1x128xf32>
    tpu.vector_store %arg6[%c0_12, %c0_13, %c0_14], %37 {strides = array<i32>} : memref<2x8x128xf32, #tpu.memory_space<vmem>>, vector<2x1x128xf32>,
    %cst_15 = arith.constant dense<0xFF800000> : vector<2xf32>
    %38 = vector.multi_reduction <maximumf>, %34, %cst_15 [1] : vector<2x128xf32> to vector<2xf32>
    %39 = vector.shape_cast %38 : vector<2xf32> to vector<2x1xf32>
    %40 = vector.broadcast %39 : vector<2x1xf32> to vector<2x128xf32>
    %41 = arith.cmpf oeq, %34, %40 : vector<2x128xf32>
    %c128_i32 = arith.constant 128 : i32
    %42 = vector.broadcast %c128_i32 : i32 to vector<2x128xi32>
    %43 = arith.select %41, %0, %42 : vector<2x128xi1>, vector<2x128xi32>
    %cst_16 = arith.constant dense<2147483647> : vector<2xi32>
    %44 = vector.multi_reduction <minsi>, %43, %cst_16 [1] : vector<2x128xi32> to vector<2xi32>
    %45 = vector.shape_cast %44 : vector<2xi32> to vector<2x1xi32>
    %46 = vector.broadcast %45 : vector<2x1xi32> to vector<2x128xi32>
    %47 = arith.cmpi eq, %0, %46 : vector<2x128xi32>
    %48 = arith.extui %47 : vector<2x128xi1> to vector<2x128xi32>
    %49 = arith.sitofp %48 : vector<2x128xi32> to vector<2x128xf32>
    %50 = vector.extract_strided_slice %33 {offsets = [0, 0], sizes = [2, 128], strides = [1, 1]} : vector<2x256xf32> to vector<2x128xf32>
    %cst_17 = arith.constant dense<0.000000e+00> : vector<2x128xf32>
    %51 = tpu.matmul %49, %1, %cst_17 {dimension_numbers = #tpu.dot_dimension_numbers<[1], [0], [0], [1], [0, 0, 1, 1], [], []>} : vector<2x128xf32>, vector<128x128xf32>, vector<2x128xf32> -> vector<2x128xf32>
    %52 = arith.addf %50, %51 : vector<2x128xf32>
    %53 = arith.negf %52 : vector<2x128xf32>
    %54 = math.exp %53 : vector<2x128xf32>
    %cst_18 = arith.constant 1.000000e+00 : f32
    %55 = vector.broadcast %cst_18 : f32 to vector<2x128xf32>
    %56 = arith.addf %55, %54 : vector<2x128xf32>
    %57 = arith.divf %55, %56 : vector<2x128xf32>
    %58 = vector.extract_strided_slice %57 {offsets = [0, 0], sizes = [2, 32], strides = [1, 1]} : vector<2x128xf32> to vector<2x32xf32>
    %59 = vector.extract_strided_slice %57 {offsets = [0, 32], sizes = [2, 32], strides = [1, 1]} : vector<2x128xf32> to vector<2x32xf32>
    %60 = vector.extract_strided_slice %52 {offsets = [0, 64], sizes = [2, 32], strides = [1, 1]} : vector<2x128xf32> to vector<2x32xf32>
    %61 = math.tanh %60 : vector<2x32xf32>
    %62 = vector.extract_strided_slice %57 {offsets = [0, 96], sizes = [2, 32], strides = [1, 1]} : vector<2x128xf32> to vector<2x32xf32>
    %63 = arith.mulf %59, %28 : vector<2x32xf32>
    %64 = arith.mulf %58, %61 : vector<2x32xf32>
    %65 = arith.addf %63, %64 : vector<2x32xf32>
    %66 = math.tanh %65 : vector<2x32xf32>
    %67 = arith.mulf %62, %66 : vector<2x32xf32>
    %cst_19 = arith.constant dense<0.000000e+00> : vector<2x256xf32>
    %68 = tpu.matmul %67, %2, %cst_19 {dimension_numbers = #tpu.dot_dimension_numbers<[1], [0], [0], [1], [0, 0, 1, 1], [], []>} : vector<2x32xf32>, vector<32x256xf32>, vector<2x256xf32> -> vector<2x256xf32>
    %69 = vector.broadcast %3 : vector<1x256xf32> to vector<2x256xf32>
    %70 = arith.addf %68, %69 : vector<2x256xf32>
    %71 = vector.extract_strided_slice %70 {offsets = [0, 128], sizes = [2, 128], strides = [1, 1]} : vector<2x256xf32> to vector<2x128xf32>
    %c0_20 = arith.constant 0 : index
    %c1 = arith.constant 1 : index
    %c0_21 = arith.constant 0 : index
    %72 = vector.load %arg6[%c0_20, %c1, %c0_21] : memref<2x8x128xf32, #tpu.memory_space<vmem>>, vector<2x1x128xf32>
    %73 = vector.shape_cast %72 : vector<2x1x128xf32> to vector<2x128xf32>
    %74 = vector.shape_cast %71 : vector<2x128xf32> to vector<2x1x128xf32>
    tpu.vector_store %arg6[%c0_20, %c1, %c0_21], %74 {strides = array<i32>} : memref<2x8x128xf32, #tpu.memory_space<vmem>>, vector<2x1x128xf32>,
    %cst_22 = arith.constant dense<0xFF800000> : vector<2xf32>
    %75 = vector.multi_reduction <maximumf>, %71, %cst_22 [1] : vector<2x128xf32> to vector<2xf32>
    %76 = vector.shape_cast %75 : vector<2xf32> to vector<2x1xf32>
    %77 = vector.broadcast %76 : vector<2x1xf32> to vector<2x128xf32>
    %78 = arith.cmpf oeq, %71, %77 : vector<2x128xf32>
    %c128_i32_23 = arith.constant 128 : i32
    %79 = vector.broadcast %c128_i32_23 : i32 to vector<2x128xi32>
    %80 = arith.select %78, %0, %79 : vector<2x128xi1>, vector<2x128xi32>
    %cst_24 = arith.constant dense<2147483647> : vector<2xi32>
    %81 = vector.multi_reduction <minsi>, %80, %cst_24 [1] : vector<2x128xi32> to vector<2xi32>
    %82 = vector.shape_cast %81 : vector<2xi32> to vector<2x1xi32>
    %83 = vector.broadcast %82 : vector<2x1xi32> to vector<2x128xi32>
    %84 = arith.cmpi eq, %0, %83 : vector<2x128xi32>
    %85 = arith.extui %84 : vector<2x128xi1> to vector<2x128xi32>
    %86 = arith.sitofp %85 : vector<2x128xi32> to vector<2x128xf32>
    %87 = vector.extract_strided_slice %70 {offsets = [0, 0], sizes = [2, 128], strides = [1, 1]} : vector<2x256xf32> to vector<2x128xf32>
    %cst_25 = arith.constant dense<0.000000e+00> : vector<2x128xf32>
    %88 = tpu.matmul %86, %1, %cst_25 {dimension_numbers = #tpu.dot_dimension_numbers<[1], [0], [0], [1], [0, 0, 1, 1], [], []>} : vector<2x128xf32>, vector<128x128xf32>, vector<2x128xf32> -> vector<2x128xf32>
    %89 = arith.addf %87, %88 : vector<2x128xf32>
    %90 = arith.negf %89 : vector<2x128xf32>
    %91 = math.exp %90 : vector<2x128xf32>
    %cst_26 = arith.constant 1.000000e+00 : f32
    %92 = vector.broadcast %cst_26 : f32 to vector<2x128xf32>
    %93 = arith.addf %92, %91 : vector<2x128xf32>
    %94 = arith.divf %92, %93 : vector<2x128xf32>
    %95 = vector.extract_strided_slice %94 {offsets = [0, 0], sizes = [2, 32], strides = [1, 1]} : vector<2x128xf32> to vector<2x32xf32>
    %96 = vector.extract_strided_slice %94 {offsets = [0, 32], sizes = [2, 32], strides = [1, 1]} : vector<2x128xf32> to vector<2x32xf32>
    %97 = vector.extract_strided_slice %89 {offsets = [0, 64], sizes = [2, 32], strides = [1, 1]} : vector<2x128xf32> to vector<2x32xf32>
    %98 = math.tanh %97 : vector<2x32xf32>
    %99 = vector.extract_strided_slice %94 {offsets = [0, 96], sizes = [2, 32], strides = [1, 1]} : vector<2x128xf32> to vector<2x32xf32>
    %100 = arith.mulf %96, %65 : vector<2x32xf32>
    %101 = arith.mulf %95, %98 : vector<2x32xf32>
    %102 = arith.addf %100, %101 : vector<2x32xf32>
    %103 = math.tanh %102 : vector<2x32xf32>
    %104 = arith.mulf %99, %103 : vector<2x32xf32>
    %cst_27 = arith.constant dense<0.000000e+00> : vector<2x256xf32>
    %105 = tpu.matmul %104, %2, %cst_27 {dimension_numbers = #tpu.dot_dimension_numbers<[1], [0], [0], [1], [0, 0, 1, 1], [], []>} : vector<2x32xf32>, vector<32x256xf32>, vector<2x256xf32> -> vector<2x256xf32>
    %106 = vector.broadcast %3 : vector<1x256xf32> to vector<2x256xf32>
    %107 = arith.addf %105, %106 : vector<2x256xf32>
    %108 = vector.extract_strided_slice %107 {offsets = [0, 128], sizes = [2, 128], strides = [1, 1]} : vector<2x256xf32> to vector<2x128xf32>
    %c0_28 = arith.constant 0 : index
    %c2 = arith.constant 2 : index
    %c0_29 = arith.constant 0 : index
    %109 = vector.load %arg6[%c0_28, %c2, %c0_29] : memref<2x8x128xf32, #tpu.memory_space<vmem>>, vector<2x1x128xf32>
    %110 = vector.shape_cast %109 : vector<2x1x128xf32> to vector<2x128xf32>
    %111 = vector.shape_cast %108 : vector<2x128xf32> to vector<2x1x128xf32>
    tpu.vector_store %arg6[%c0_28, %c2, %c0_29], %111 {strides = array<i32>} : memref<2x8x128xf32, #tpu.memory_space<vmem>>, vector<2x1x128xf32>,
    %cst_30 = arith.constant dense<0xFF800000> : vector<2xf32>
    %112 = vector.multi_reduction <maximumf>, %108, %cst_30 [1] : vector<2x128xf32> to vector<2xf32>
    %113 = vector.shape_cast %112 : vector<2xf32> to vector<2x1xf32>
    %114 = vector.broadcast %113 : vector<2x1xf32> to vector<2x128xf32>
    %115 = arith.cmpf oeq, %108, %114 : vector<2x128xf32>
    %c128_i32_31 = arith.constant 128 : i32
    %116 = vector.broadcast %c128_i32_31 : i32 to vector<2x128xi32>
    %117 = arith.select %115, %0, %116 : vector<2x128xi1>, vector<2x128xi32>
    %cst_32 = arith.constant dense<2147483647> : vector<2xi32>
    %118 = vector.multi_reduction <minsi>, %117, %cst_32 [1] : vector<2x128xi32> to vector<2xi32>
    %119 = vector.shape_cast %118 : vector<2xi32> to vector<2x1xi32>
    %120 = vector.broadcast %119 : vector<2x1xi32> to vector<2x128xi32>
    %121 = arith.cmpi eq, %0, %120 : vector<2x128xi32>
    %122 = arith.extui %121 : vector<2x128xi1> to vector<2x128xi32>
    %123 = arith.sitofp %122 : vector<2x128xi32> to vector<2x128xf32>
    %124 = vector.extract_strided_slice %107 {offsets = [0, 0], sizes = [2, 128], strides = [1, 1]} : vector<2x256xf32> to vector<2x128xf32>
    %cst_33 = arith.constant dense<0.000000e+00> : vector<2x128xf32>
    %125 = tpu.matmul %123, %1, %cst_33 {dimension_numbers = #tpu.dot_dimension_numbers<[1], [0], [0], [1], [0, 0, 1, 1], [], []>} : vector<2x128xf32>, vector<128x128xf32>, vector<2x128xf32> -> vector<2x128xf32>
    %126 = arith.addf %124, %125 : vector<2x128xf32>
    %127 = arith.negf %126 : vector<2x128xf32>
    %128 = math.exp %127 : vector<2x128xf32>
    %cst_34 = arith.constant 1.000000e+00 : f32
    %129 = vector.broadcast %cst_34 : f32 to vector<2x128xf32>
    %130 = arith.addf %129, %128 : vector<2x128xf32>
    %131 = arith.divf %129, %130 : vector<2x128xf32>
    %132 = vector.extract_strided_slice %131 {offsets = [0, 0], sizes = [2, 32], strides = [1, 1]} : vector<2x128xf32> to vector<2x32xf32>
    %133 = vector.extract_strided_slice %131 {offsets = [0, 32], sizes = [2, 32], strides = [1, 1]} : vector<2x128xf32> to vector<2x32xf32>
    %134 = vector.extract_strided_slice %126 {offsets = [0, 64], sizes = [2, 32], strides = [1, 1]} : vector<2x128xf32> to vector<2x32xf32>
    %135 = math.tanh %134 : vector<2x32xf32>
    %136 = vector.extract_strided_slice %131 {offsets = [0, 96], sizes = [2, 32], strides = [1, 1]} : vector<2x128xf32> to vector<2x32xf32>
    %137 = arith.mulf %133, %102 : vector<2x32xf32>
    %138 = arith.mulf %132, %135 : vector<2x32xf32>
    %139 = arith.addf %137, %138 : vector<2x32xf32>
    %140 = math.tanh %139 : vector<2x32xf32>
    %141 = arith.mulf %136, %140 : vector<2x32xf32>
    %cst_35 = arith.constant dense<0.000000e+00> : vector<2x256xf32>
    %142 = tpu.matmul %141, %2, %cst_35 {dimension_numbers = #tpu.dot_dimension_numbers<[1], [0], [0], [1], [0, 0, 1, 1], [], []>} : vector<2x32xf32>, vector<32x256xf32>, vector<2x256xf32> -> vector<2x256xf32>
    %143 = vector.broadcast %3 : vector<1x256xf32> to vector<2x256xf32>
    %144 = arith.addf %142, %143 : vector<2x256xf32>
    %145 = vector.extract_strided_slice %144 {offsets = [0, 128], sizes = [2, 128], strides = [1, 1]} : vector<2x256xf32> to vector<2x128xf32>
    %c0_36 = arith.constant 0 : index
    %c3 = arith.constant 3 : index
    %c0_37 = arith.constant 0 : index
    %146 = vector.load %arg6[%c0_36, %c3, %c0_37] : memref<2x8x128xf32, #tpu.memory_space<vmem>>, vector<2x1x128xf32>
    %147 = vector.shape_cast %146 : vector<2x1x128xf32> to vector<2x128xf32>
    %148 = vector.shape_cast %145 : vector<2x128xf32> to vector<2x1x128xf32>
    tpu.vector_store %arg6[%c0_36, %c3, %c0_37], %148 {strides = array<i32>} : memref<2x8x128xf32, #tpu.memory_space<vmem>>, vector<2x1x128xf32>,
    %cst_38 = arith.constant dense<0xFF800000> : vector<2xf32>
    %149 = vector.multi_reduction <maximumf>, %145, %cst_38 [1] : vector<2x128xf32> to vector<2xf32>
    %150 = vector.shape_cast %149 : vector<2xf32> to vector<2x1xf32>
    %151 = vector.broadcast %150 : vector<2x1xf32> to vector<2x128xf32>
    %152 = arith.cmpf oeq, %145, %151 : vector<2x128xf32>
    %c128_i32_39 = arith.constant 128 : i32
    %153 = vector.broadcast %c128_i32_39 : i32 to vector<2x128xi32>
    %154 = arith.select %152, %0, %153 : vector<2x128xi1>, vector<2x128xi32>
    %cst_40 = arith.constant dense<2147483647> : vector<2xi32>
    %155 = vector.multi_reduction <minsi>, %154, %cst_40 [1] : vector<2x128xi32> to vector<2xi32>
    %156 = vector.shape_cast %155 : vector<2xi32> to vector<2x1xi32>
    %157 = vector.broadcast %156 : vector<2x1xi32> to vector<2x128xi32>
    %158 = arith.cmpi eq, %0, %157 : vector<2x128xi32>
    %159 = arith.extui %158 : vector<2x128xi1> to vector<2x128xi32>
    %160 = arith.sitofp %159 : vector<2x128xi32> to vector<2x128xf32>
    %161 = vector.extract_strided_slice %144 {offsets = [0, 0], sizes = [2, 128], strides = [1, 1]} : vector<2x256xf32> to vector<2x128xf32>
    %cst_41 = arith.constant dense<0.000000e+00> : vector<2x128xf32>
    %162 = tpu.matmul %160, %1, %cst_41 {dimension_numbers = #tpu.dot_dimension_numbers<[1], [0], [0], [1], [0, 0, 1, 1], [], []>} : vector<2x128xf32>, vector<128x128xf32>, vector<2x128xf32> -> vector<2x128xf32>
    %163 = arith.addf %161, %162 : vector<2x128xf32>
    %164 = arith.negf %163 : vector<2x128xf32>
    %165 = math.exp %164 : vector<2x128xf32>
    %cst_42 = arith.constant 1.000000e+00 : f32
    %166 = vector.broadcast %cst_42 : f32 to vector<2x128xf32>
    %167 = arith.addf %166, %165 : vector<2x128xf32>
    %168 = arith.divf %166, %167 : vector<2x128xf32>
    %169 = vector.extract_strided_slice %168 {offsets = [0, 0], sizes = [2, 32], strides = [1, 1]} : vector<2x128xf32> to vector<2x32xf32>
    %170 = vector.extract_strided_slice %168 {offsets = [0, 32], sizes = [2, 32], strides = [1, 1]} : vector<2x128xf32> to vector<2x32xf32>
    %171 = vector.extract_strided_slice %163 {offsets = [0, 64], sizes = [2, 32], strides = [1, 1]} : vector<2x128xf32> to vector<2x32xf32>
    %172 = math.tanh %171 : vector<2x32xf32>
    %173 = vector.extract_strided_slice %168 {offsets = [0, 96], sizes = [2, 32], strides = [1, 1]} : vector<2x128xf32> to vector<2x32xf32>
    %174 = arith.mulf %170, %139 : vector<2x32xf32>
    %175 = arith.mulf %169, %172 : vector<2x32xf32>
    %176 = arith.addf %174, %175 : vector<2x32xf32>
    %177 = math.tanh %176 : vector<2x32xf32>
    %178 = arith.mulf %173, %177 : vector<2x32xf32>
    %cst_43 = arith.constant dense<0.000000e+00> : vector<2x256xf32>
    %179 = tpu.matmul %178, %2, %cst_43 {dimension_numbers = #tpu.dot_dimension_numbers<[1], [0], [0], [1], [0, 0, 1, 1], [], []>} : vector<2x32xf32>, vector<32x256xf32>, vector<2x256xf32> -> vector<2x256xf32>
    %180 = vector.broadcast %3 : vector<1x256xf32> to vector<2x256xf32>
    %181 = arith.addf %179, %180 : vector<2x256xf32>
    %182 = vector.extract_strided_slice %181 {offsets = [0, 128], sizes = [2, 128], strides = [1, 1]} : vector<2x256xf32> to vector<2x128xf32>
    %c0_44 = arith.constant 0 : index
    %c4 = arith.constant 4 : index
    %c0_45 = arith.constant 0 : index
    %183 = vector.load %arg6[%c0_44, %c4, %c0_45] : memref<2x8x128xf32, #tpu.memory_space<vmem>>, vector<2x1x128xf32>
    %184 = vector.shape_cast %183 : vector<2x1x128xf32> to vector<2x128xf32>
    %185 = vector.shape_cast %182 : vector<2x128xf32> to vector<2x1x128xf32>
    tpu.vector_store %arg6[%c0_44, %c4, %c0_45], %185 {strides = array<i32>} : memref<2x8x128xf32, #tpu.memory_space<vmem>>, vector<2x1x128xf32>,
    %cst_46 = arith.constant dense<0xFF800000> : vector<2xf32>
    %186 = vector.multi_reduction <maximumf>, %182, %cst_46 [1] : vector<2x128xf32> to vector<2xf32>
    %187 = vector.shape_cast %186 : vector<2xf32> to vector<2x1xf32>
    %188 = vector.broadcast %187 : vector<2x1xf32> to vector<2x128xf32>
    %189 = arith.cmpf oeq, %182, %188 : vector<2x128xf32>
    %c128_i32_47 = arith.constant 128 : i32
    %190 = vector.broadcast %c128_i32_47 : i32 to vector<2x128xi32>
    %191 = arith.select %189, %0, %190 : vector<2x128xi1>, vector<2x128xi32>
    %cst_48 = arith.constant dense<2147483647> : vector<2xi32>
    %192 = vector.multi_reduction <minsi>, %191, %cst_48 [1] : vector<2x128xi32> to vector<2xi32>
    %193 = vector.shape_cast %192 : vector<2xi32> to vector<2x1xi32>
    %194 = vector.broadcast %193 : vector<2x1xi32> to vector<2x128xi32>
    %195 = arith.cmpi eq, %0, %194 : vector<2x128xi32>
    %196 = arith.extui %195 : vector<2x128xi1> to vector<2x128xi32>
    %197 = arith.sitofp %196 : vector<2x128xi32> to vector<2x128xf32>
    %198 = vector.extract_strided_slice %181 {offsets = [0, 0], sizes = [2, 128], strides = [1, 1]} : vector<2x256xf32> to vector<2x128xf32>
    %cst_49 = arith.constant dense<0.000000e+00> : vector<2x128xf32>
    %199 = tpu.matmul %197, %1, %cst_49 {dimension_numbers = #tpu.dot_dimension_numbers<[1], [0], [0], [1], [0, 0, 1, 1], [], []>} : vector<2x128xf32>, vector<128x128xf32>, vector<2x128xf32> -> vector<2x128xf32>
    %200 = arith.addf %198, %199 : vector<2x128xf32>
    %201 = arith.negf %200 : vector<2x128xf32>
    %202 = math.exp %201 : vector<2x128xf32>
    %cst_50 = arith.constant 1.000000e+00 : f32
    %203 = vector.broadcast %cst_50 : f32 to vector<2x128xf32>
    %204 = arith.addf %203, %202 : vector<2x128xf32>
    %205 = arith.divf %203, %204 : vector<2x128xf32>
    %206 = vector.extract_strided_slice %205 {offsets = [0, 0], sizes = [2, 32], strides = [1, 1]} : vector<2x128xf32> to vector<2x32xf32>
    %207 = vector.extract_strided_slice %205 {offsets = [0, 32], sizes = [2, 32], strides = [1, 1]} : vector<2x128xf32> to vector<2x32xf32>
    %208 = vector.extract_strided_slice %200 {offsets = [0, 64], sizes = [2, 32], strides = [1, 1]} : vector<2x128xf32> to vector<2x32xf32>
    %209 = math.tanh %208 : vector<2x32xf32>
    %210 = vector.extract_strided_slice %205 {offsets = [0, 96], sizes = [2, 32], strides = [1, 1]} : vector<2x128xf32> to vector<2x32xf32>
    %211 = arith.mulf %207, %176 : vector<2x32xf32>
    %212 = arith.mulf %206, %209 : vector<2x32xf32>
    %213 = arith.addf %211, %212 : vector<2x32xf32>
    %214 = math.tanh %213 : vector<2x32xf32>
    %215 = arith.mulf %210, %214 : vector<2x32xf32>
    %cst_51 = arith.constant dense<0.000000e+00> : vector<2x256xf32>
    %216 = tpu.matmul %215, %2, %cst_51 {dimension_numbers = #tpu.dot_dimension_numbers<[1], [0], [0], [1], [0, 0, 1, 1], [], []>} : vector<2x32xf32>, vector<32x256xf32>, vector<2x256xf32> -> vector<2x256xf32>
    %217 = vector.broadcast %3 : vector<1x256xf32> to vector<2x256xf32>
    %218 = arith.addf %216, %217 : vector<2x256xf32>
    %219 = vector.extract_strided_slice %218 {offsets = [0, 128], sizes = [2, 128], strides = [1, 1]} : vector<2x256xf32> to vector<2x128xf32>
    %c0_52 = arith.constant 0 : index
    %c5 = arith.constant 5 : index
    %c0_53 = arith.constant 0 : index
    %220 = vector.load %arg6[%c0_52, %c5, %c0_53] : memref<2x8x128xf32, #tpu.memory_space<vmem>>, vector<2x1x128xf32>
    %221 = vector.shape_cast %220 : vector<2x1x128xf32> to vector<2x128xf32>
    %222 = vector.shape_cast %219 : vector<2x128xf32> to vector<2x1x128xf32>
    tpu.vector_store %arg6[%c0_52, %c5, %c0_53], %222 {strides = array<i32>} : memref<2x8x128xf32, #tpu.memory_space<vmem>>, vector<2x1x128xf32>,
    %cst_54 = arith.constant dense<0xFF800000> : vector<2xf32>
    %223 = vector.multi_reduction <maximumf>, %219, %cst_54 [1] : vector<2x128xf32> to vector<2xf32>
    %224 = vector.shape_cast %223 : vector<2xf32> to vector<2x1xf32>
    %225 = vector.broadcast %224 : vector<2x1xf32> to vector<2x128xf32>
    %226 = arith.cmpf oeq, %219, %225 : vector<2x128xf32>
    %c128_i32_55 = arith.constant 128 : i32
    %227 = vector.broadcast %c128_i32_55 : i32 to vector<2x128xi32>
    %228 = arith.select %226, %0, %227 : vector<2x128xi1>, vector<2x128xi32>
    %cst_56 = arith.constant dense<2147483647> : vector<2xi32>
    %229 = vector.multi_reduction <minsi>, %228, %cst_56 [1] : vector<2x128xi32> to vector<2xi32>
    %230 = vector.shape_cast %229 : vector<2xi32> to vector<2x1xi32>
    %231 = vector.broadcast %230 : vector<2x1xi32> to vector<2x128xi32>
    %232 = arith.cmpi eq, %0, %231 : vector<2x128xi32>
    %233 = arith.extui %232 : vector<2x128xi1> to vector<2x128xi32>
    %234 = arith.sitofp %233 : vector<2x128xi32> to vector<2x128xf32>
    %235 = vector.extract_strided_slice %218 {offsets = [0, 0], sizes = [2, 128], strides = [1, 1]} : vector<2x256xf32> to vector<2x128xf32>
    %cst_57 = arith.constant dense<0.000000e+00> : vector<2x128xf32>
    %236 = tpu.matmul %234, %1, %cst_57 {dimension_numbers = #tpu.dot_dimension_numbers<[1], [0], [0], [1], [0, 0, 1, 1], [], []>} : vector<2x128xf32>, vector<128x128xf32>, vector<2x128xf32> -> vector<2x128xf32>
    %237 = arith.addf %235, %236 : vector<2x128xf32>
    %238 = arith.negf %237 : vector<2x128xf32>
    %239 = math.exp %238 : vector<2x128xf32>
    %cst_58 = arith.constant 1.000000e+00 : f32
    %240 = vector.broadcast %cst_58 : f32 to vector<2x128xf32>
    %241 = arith.addf %240, %239 : vector<2x128xf32>
    %242 = arith.divf %240, %241 : vector<2x128xf32>
    %243 = vector.extract_strided_slice %242 {offsets = [0, 0], sizes = [2, 32], strides = [1, 1]} : vector<2x128xf32> to vector<2x32xf32>
    %244 = vector.extract_strided_slice %242 {offsets = [0, 32], sizes = [2, 32], strides = [1, 1]} : vector<2x128xf32> to vector<2x32xf32>
    %245 = vector.extract_strided_slice %237 {offsets = [0, 64], sizes = [2, 32], strides = [1, 1]} : vector<2x128xf32> to vector<2x32xf32>
    %246 = math.tanh %245 : vector<2x32xf32>
    %247 = vector.extract_strided_slice %242 {offsets = [0, 96], sizes = [2, 32], strides = [1, 1]} : vector<2x128xf32> to vector<2x32xf32>
    %248 = arith.mulf %244, %213 : vector<2x32xf32>
    %249 = arith.mulf %243, %246 : vector<2x32xf32>
    %250 = arith.addf %248, %249 : vector<2x32xf32>
    %251 = math.tanh %250 : vector<2x32xf32>
    %252 = arith.mulf %247, %251 : vector<2x32xf32>
    %cst_59 = arith.constant dense<0.000000e+00> : vector<2x256xf32>
    %253 = tpu.matmul %252, %2, %cst_59 {dimension_numbers = #tpu.dot_dimension_numbers<[1], [0], [0], [1], [0, 0, 1, 1], [], []>} : vector<2x32xf32>, vector<32x256xf32>, vector<2x256xf32> -> vector<2x256xf32>
    %254 = vector.broadcast %3 : vector<1x256xf32> to vector<2x256xf32>
    %255 = arith.addf %253, %254 : vector<2x256xf32>
    %256 = vector.extract_strided_slice %255 {offsets = [0, 128], sizes = [2, 128], strides = [1, 1]} : vector<2x256xf32> to vector<2x128xf32>
    %c0_60 = arith.constant 0 : index
    %c6 = arith.constant 6 : index
    %c0_61 = arith.constant 0 : index
    %257 = vector.load %arg6[%c0_60, %c6, %c0_61] : memref<2x8x128xf32, #tpu.memory_space<vmem>>, vector<2x1x128xf32>
    %258 = vector.shape_cast %257 : vector<2x1x128xf32> to vector<2x128xf32>
    %259 = vector.shape_cast %256 : vector<2x128xf32> to vector<2x1x128xf32>
    tpu.vector_store %arg6[%c0_60, %c6, %c0_61], %259 {strides = array<i32>} : memref<2x8x128xf32, #tpu.memory_space<vmem>>, vector<2x1x128xf32>,
    %cst_62 = arith.constant dense<0xFF800000> : vector<2xf32>
    %260 = vector.multi_reduction <maximumf>, %256, %cst_62 [1] : vector<2x128xf32> to vector<2xf32>
    %261 = vector.shape_cast %260 : vector<2xf32> to vector<2x1xf32>
    %262 = vector.broadcast %261 : vector<2x1xf32> to vector<2x128xf32>
    %263 = arith.cmpf oeq, %256, %262 : vector<2x128xf32>
    %c128_i32_63 = arith.constant 128 : i32
    %264 = vector.broadcast %c128_i32_63 : i32 to vector<2x128xi32>
    %265 = arith.select %263, %0, %264 : vector<2x128xi1>, vector<2x128xi32>
    %cst_64 = arith.constant dense<2147483647> : vector<2xi32>
    %266 = vector.multi_reduction <minsi>, %265, %cst_64 [1] : vector<2x128xi32> to vector<2xi32>
    %267 = vector.shape_cast %266 : vector<2xi32> to vector<2x1xi32>
    %268 = vector.broadcast %267 : vector<2x1xi32> to vector<2x128xi32>
    %269 = arith.cmpi eq, %0, %268 : vector<2x128xi32>
    %270 = arith.extui %269 : vector<2x128xi1> to vector<2x128xi32>
    %271 = arith.sitofp %270 : vector<2x128xi32> to vector<2x128xf32>
    %272 = vector.extract_strided_slice %255 {offsets = [0, 0], sizes = [2, 128], strides = [1, 1]} : vector<2x256xf32> to vector<2x128xf32>
    %cst_65 = arith.constant dense<0.000000e+00> : vector<2x128xf32>
    %273 = tpu.matmul %271, %1, %cst_65 {dimension_numbers = #tpu.dot_dimension_numbers<[1], [0], [0], [1], [0, 0, 1, 1], [], []>} : vector<2x128xf32>, vector<128x128xf32>, vector<2x128xf32> -> vector<2x128xf32>
    %274 = arith.addf %272, %273 : vector<2x128xf32>
    %275 = arith.negf %274 : vector<2x128xf32>
    %276 = math.exp %275 : vector<2x128xf32>
    %cst_66 = arith.constant 1.000000e+00 : f32
    %277 = vector.broadcast %cst_66 : f32 to vector<2x128xf32>
    %278 = arith.addf %277, %276 : vector<2x128xf32>
    %279 = arith.divf %277, %278 : vector<2x128xf32>
    %280 = vector.extract_strided_slice %279 {offsets = [0, 0], sizes = [2, 32], strides = [1, 1]} : vector<2x128xf32> to vector<2x32xf32>
    %281 = vector.extract_strided_slice %279 {offsets = [0, 32], sizes = [2, 32], strides = [1, 1]} : vector<2x128xf32> to vector<2x32xf32>
    %282 = vector.extract_strided_slice %274 {offsets = [0, 64], sizes = [2, 32], strides = [1, 1]} : vector<2x128xf32> to vector<2x32xf32>
    %283 = math.tanh %282 : vector<2x32xf32>
    %284 = vector.extract_strided_slice %279 {offsets = [0, 96], sizes = [2, 32], strides = [1, 1]} : vector<2x128xf32> to vector<2x32xf32>
    %285 = arith.mulf %281, %250 : vector<2x32xf32>
    %286 = arith.mulf %280, %283 : vector<2x32xf32>
    %287 = arith.addf %285, %286 : vector<2x32xf32>
    %288 = math.tanh %287 : vector<2x32xf32>
    %289 = arith.mulf %284, %288 : vector<2x32xf32>
    %cst_67 = arith.constant dense<0.000000e+00> : vector<2x256xf32>
    %290 = tpu.matmul %289, %2, %cst_67 {dimension_numbers = #tpu.dot_dimension_numbers<[1], [0], [0], [1], [0, 0, 1, 1], [], []>} : vector<2x32xf32>, vector<32x256xf32>, vector<2x256xf32> -> vector<2x256xf32>
    %291 = vector.broadcast %3 : vector<1x256xf32> to vector<2x256xf32>
    %292 = arith.addf %290, %291 : vector<2x256xf32>
    %293 = vector.extract_strided_slice %292 {offsets = [0, 128], sizes = [2, 128], strides = [1, 1]} : vector<2x256xf32> to vector<2x128xf32>
    %c0_68 = arith.constant 0 : index
    %c7 = arith.constant 7 : index
    %c0_69 = arith.constant 0 : index
    %294 = vector.load %arg6[%c0_68, %c7, %c0_69] : memref<2x8x128xf32, #tpu.memory_space<vmem>>, vector<2x1x128xf32>
    %295 = vector.shape_cast %294 : vector<2x1x128xf32> to vector<2x128xf32>
    %296 = vector.shape_cast %293 : vector<2x128xf32> to vector<2x1x128xf32>
    tpu.vector_store %arg6[%c0_68, %c7, %c0_69], %296 {strides = array<i32>} : memref<2x8x128xf32, #tpu.memory_space<vmem>>, vector<2x1x128xf32>,
    %c0_70 = arith.constant 0 : index
    %c0_71 = arith.constant 0 : index
    %297 = vector.load %arg7[%c0_70, %c0_71] : memref<2x32xf32, #tpu.memory_space<vmem>>, vector<2x32xf32>
    tpu.vector_store %arg7[%c0_70, %c0_71], %289 {strides = array<i32>} : memref<2x32xf32, #tpu.memory_space<vmem>>, vector<2x32xf32>,
    return
  }
  func.func @transform_0(%arg0: i32) -> (i32, i32) {
    %c0_i32 = arith.constant 0 : i32
    %c0_i32_0 = arith.constant 0 : i32
    %c0_i32_1 = arith.constant 0 : i32
    return %c0_i32, %c0_i32_0 : i32, i32
  }
  func.func @transform_1(%arg0: i32) -> (i32, i32) {
    %c0_i32 = arith.constant 0 : i32
    %c0_i32_0 = arith.constant 0 : i32
    %c0_i32_1 = arith.constant 0 : i32
    return %c0_i32, %c0_i32_0 : i32, i32
  }
  func.func @transform_2(%arg0: i32) -> (i32, i32) {
    %c0_i32 = arith.constant 0 : i32
    %c0_i32_0 = arith.constant 0 : i32
    %c0_i32_1 = arith.constant 0 : i32
    return %c0_i32, %c0_i32_0 : i32, i32
  }
  func.func @transform_3(%arg0: i32) -> (i32, i32) {
    %c0_i32 = arith.constant 0 : i32
    %c0_i32_0 = arith.constant 0 : i32
    %c0_i32_1 = arith.constant 0 : i32
    return %c0_i32, %c0_i32_0 : i32, i32
  }
  func.func @transform_4(%arg0: i32) -> (i32, i32) {
    %c0_i32 = arith.constant 0 : i32
    %c0_i32_0 = arith.constant 0 : i32
    %c0_i32_1 = arith.constant 0 : i32
    return %c0_i32, %c0_i32_0 : i32, i32
  }
  func.func @transform_5(%arg0: i32) -> (i32, i32, i32) {
    %c0_i32 = arith.constant 0 : i32
    %c0_i32_0 = arith.constant 0 : i32
    %c0_i32_1 = arith.constant 0 : i32
    %c0_i32_2 = arith.constant 0 : i32
    return %c0_i32, %c0_i32_0, %c0_i32_1 : i32, i32, i32
  }
  func.func @transform_6(%arg0: i32) -> (i32, i32) {
    %c0_i32 = arith.constant 0 : i32
    %c0_i32_0 = arith.constant 0 : i32
    %c0_i32_1 = arith.constant 0 : i32
    return %c0_i32, %c0_i32_0 : i32, i32
  }
}

</mosaic_0001>

<bundles_post_ra>
// kernel: tpu_custom_call.1
= control target key start
LH: loop header
LB: loop body
LE: loop exit
PB: predicated region body
PF: predicated region fallthrough
CT: control target
= control target key end

     0   :  { %12 = vsyncpa [#allocation3], 0  ;;  %s3325_s0 = inlined_call_operand.hbm [shape: f32[128,128], index: 0, kind: input, shape index: {}]   ;;  %s3326_s1 = inlined_call_operand.hbm [shape: f32[32,256], index: 1, kind: input, shape index: {}]   ;;  %s3327_s2 = inlined_call_operand.vmem [shape: f32[1,256], index: 2, kind: input, shape index: {}]   ;;  %s3328_s3 = inlined_call_operand.vmem [shape: f32[2,32], index: 3, kind: input, shape index: {}]   ;;  %s3329_s4 = inlined_call_operand.vmem [shape: f32[2,32], index: 4, kind: input, shape index: {}]   ;;  %s3330_s5 = inlined_call_operand.hbm [shape: f32[2,8,128], index: 5, kind: output, shape index: {0}]   ;;  %s3331_s6 = inlined_call_operand.hbm [shape: f32[2,32], index: 6, kind: output, shape index: {1}]  }
   0x1   :  { %13 = vsyncpa [#allocation6], 0 }
   0x2   :  { %14 = vsyncpa [#allocation4], 0 }
   0x3   :  { %15 = vsyncpa [#allocation9], 0  ;;  %s2860_s21 = smov [#allocation2]   ;;  %s2764_s25 = scalar_lea.hbm %s3325_s0, 2048 }
   0x4   :  { %s21_s22 = sshll.u32 %s2860_s21, 4  ;;  %p2765_p0 = scmp.ne.s32.totalorder %s3325_s0, %s2764_s25  ;;  %s22_s22 = int_to_ptr.vmem [resolvable:$true] %s21_s22 }
   0x5   :  { %p2768_p1 = scmp.lt.u32.totalorder %s2764_s25, %s3325_s0 }
   0x7   :  { %p2770_p2 = pnand %p2768_p1, %p2765_p0 }
   0x9   :  { %2773 = shalt.err (!%p2770_p2)
}
   0xa   :  { %s2774_s30 = scalar_lea.vmem %s22_s22, 2048  ;;  %p2779_p4 = scmp.lt.s32.totalorder %s22_s22, %s22_s22 }
   0xb   :  { %p2775_p3 = scmp.ne.s32.totalorder %s22_s22, %s2774_s30  ;;  %p2780_p5 = scmp.lt.s32.totalorder %s2774_s30, %s2774_s30 }
   0xd   :  { %p2781_p6 = por %p2780_p5, %p2779_p4 }
   0xf   :  { %p2782_p7 = pnand %p2781_p6, %p2775_p3 }
  0x11   :  { %2785 = shalt.err (!%p2782_p7)
}
  0x12   :  { %s2861_s7 = smov 128   ;;  %s2862_s8 = smov 8  }
  0x13   :  { %27 = dma.hbm_to_vmem [thread:$0]  %s3325_s0, 2048, %s22_s22, [#allocation3], %s2861_s7, %s2861_s7, %s2862_s8  }
  0x14   :  { %s2863_s11 = smov [#allocation5]   ;;  %s2786_s15 = scalar_lea.hbm %s3326_s1, 1024 }
  0x15   :  { %s33_s12 = sshll.u32 %s2863_s11, 4  ;;  %p2787_p8 = scmp.ne.s32.totalorder %s3326_s1, %s2786_s15  ;;  %s34_s12 = int_to_ptr.vmem [resolvable:$true] %s33_s12 }
  0x16   :  { %p2790_p9 = scmp.lt.u32.totalorder %s2786_s15, %s3326_s1 }
  0x18   :  { %p2792_p10 = pnand %p2790_p9, %p2787_p8 }
  0x1a   :  { %2795 = shalt.err (!%p2792_p10)
}
  0x1b   :  { %s2796_s20 = scalar_lea.vmem %s34_s12, 1024  ;;  %p2801_p12 = scmp.lt.s32.totalorder %s34_s12, %s34_s12 }
  0x1c   :  { %p2797_p11 = scmp.ne.s32.totalorder %s34_s12, %s2796_s20  ;;  %p2802_p13 = scmp.lt.s32.totalorder %s2796_s20, %s2796_s20 }
  0x1e   :  { %p2803_p0 = por %p2802_p13, %p2801_p12 }
  0x20   :  { %p2804_p1 = pnand %p2803_p0, %p2797_p11 }
  0x22   :  { %2807 = shalt.err (!%p2804_p1)
}
  0x23   :  { %s2864_s0 = smov 256   ;;  %s2865_s21 = smov 16  }
  0x24   :  { %39 = dma.hbm_to_vmem [thread:$0]  %s3326_s1, 1024, %s34_s12, [#allocation6], %s2864_s0, %s2864_s0, %s2865_s21  }
  0x25   :  { %2852 = dma.done.wait [#allocation3], 2048  }
  0x26   :  { %2853 = vsyncadd [#allocation3], 4294965248 }
  0x27   :  { %2854 = dma.done.wait [#allocation6], 1024  }
  0x28   :  { %2855 = vsyncadd [#allocation6], 4294966272  ;;  %v2866_v0 = vmov 0.0   ;;  %v71_v1 = vld [vmem:[#allocation5 + $0x8] sm:$0xff]  ;;  %v73_v2 = vld [vmem:[#allocation5 + $0x18] sm:$0xff]  ;;  %vm95_vm0 = vcmask 261120   ;;  %v52_v36 = vlaneseq }
  0x29   :  { %163 = vmatprep.mubr.f32.mxu0 %v2866_v0  ;;  %337 = vmatprep.mubr.f32.mxu1 %v2866_v0  ;;  %v70_v3 = vld [vmem:[#allocation5] sm:$0xff]  ;;  %v2939_v4 = vpack.c.bf16 %v73_v2, %v71_v1  ;;  %v72_v5 = vld [vmem:[#allocation5 + $0x10] sm:$0xff]  ;;  %v75_v6 = vld [vmem:[#allocation5 + $0x28] sm:$0xff]  ;;  %v2867_v17 = vmov 0.0|0.0   ;;  %vm2868_vm1 = vmmov 0   ;;  %v2869_v41 = vmov 1.0  }
  0x2a   :  { %v77_v7 = vld [vmem:[#allocation5 + $0x38] sm:$0xff]  ;;  %v2941_v8 = vpack.c.bf16 %v72_v5, %v70_v3  ;;  %v74_v10 = vld [vmem:[#allocation5 + $0x20] sm:$0xff]  ;;  %v76_v11 = vld [vmem:[#allocation5 + $0x30] sm:$0xff]  ;;  %v2992_v40 = vand.u32 127, %v52_v36  ;;  %v86_v42 = vshrl.u32 %v52_v36, 7  ;;  %s2870_s26 = smov 64  }
  0x2b   :  { %v2943_v9 = vpack.c.bf16 %v77_v7, %v75_v6  ;;  %2419 = vmatprep.subr.bf16.mxu0 %v2939_v4  ;;  %2451 = vmatprep.subr.bf16.mxu1 %v2939_v4  ;;  %v2948_v12 = vpack.c.bf16 %v76_v11, %v74_v10  ;;  %v54_v13 = vld [vmem:[#allocation2] sm:$0xff]  ;;  %v55_v14 = vld [vmem:[#allocation2 + $0x8] sm:$0xff]  ;;  %v56_v18 = vld [vmem:[#allocation2 + $0x10] sm:$0xff]  ;;  %s2871_s29 = smov 32   ;;  %v2872_v2 = vmov 1966171168  }
  0x2c   :  { %2421 = vmatpush1.bf16.msra.mxu0 %v2941_v8  ;;  %2453 = vmatpush1.bf16.msra.mxu1 %v2941_v8  ;;  %v79_v15 = vld [vmem:[%s3328_s3] sm:$0x3]  ;;  %v2957_v16 = vpack.c.bf16 %v55_v14, %v54_v13  ;;  %v57_v19 = vld [vmem:[#allocation2 + $0x18] sm:$0xff]  ;;  %v59_v22 = vld [vmem:[#allocation2 + $0x28] sm:$0xff]  ;;  %vm81_vm2 = vcmp.eq.s32.totalorder %v2992_v40, 1  ;;  %v87_v43 = vsub.s32 0, %v86_v42  ;;  %v346_v3 = vunpack.c.l.s4 %v2872_v2 }
  0x2d   :  { %2423 = vmatprep.subr.bf16.mxu0 %v2943_v9  ;;  %2455 = vmatprep.subr.bf16.mxu1 %v2943_v9  ;;  %v2964_v20 = vpack.c.bf16 %v57_v19, %v56_v18  ;;  %v58_v21 = vld [vmem:[#allocation2 + $0x20] sm:$0xff]  ;;  %v60_v24 = vld [vmem:[#allocation2 + $0x30] sm:$0xff]  ;;  %v61_v25 = vld [vmem:[#allocation2 + $0x38] sm:$0xff]  ;;  %v91_v5 = vsub.s32 1, %v86_v42  ;;  %vm371_vm3 = vcmask 1041408  }
  0x2e   :  { %v2970_v23 = vpack.c.bf16 %v59_v22, %v58_v21  ;;  %v2974_v26 = vpack.c.bf16 %v61_v25, %v60_v24  ;;  %v62_v27 = vld [vmem:[#allocation2 + $0x40] sm:$0xff]  ;;  %v63_v28 = vld [vmem:[#allocation2 + $0x48] sm:$0xff]  ;;  %v64_v30 = vld [vmem:[#allocation2 + $0x50] sm:$0xff]  ;;  %v347_v6 = vunpack.c.0.s8 %v346_v3 }
  0x2f   :  { %v2978_v29 = vpack.c.bf16 %v63_v28, %v62_v27  ;;  %v65_v31 = vld [vmem:[#allocation2 + $0x58] sm:$0xff]  ;;  %v66_v33 = vld [vmem:[#allocation2 + $0x60] sm:$0xff]  ;;  %v67_v34 = vld [vmem:[#allocation2 + $0x68] sm:$0xff] }
  0x30   :  { %2425 = vmatpush1.bf16.msra.mxu0 %v2948_v12  ;;  %2457 = vmatpush1.bf16.msra.mxu1 %v2948_v12  ;;  %v2982_v32 = vpack.c.bf16 %v65_v31, %v64_v30  ;;  %v2986_v35 = vpack.c.bf16 %v67_v34, %v66_v33  ;;  %v68_v37 = vld [vmem:[#allocation2 + $0x70] sm:$0xff]  ;;  %v69_v38 = vld [vmem:[#allocation2 + $0x78] sm:$0xff]  ;;  %v78_v44 = vld [vmem:[%s3327_s2] sm:$0x3]  ;;  %v3042_v11 = vsub.s32 %v347_v6, %v86_v42  ;;  %s2873_s2 = smov [#allocation8]  }
  0x31   :  { %2426 = vmatprep.subr.bf16.mxu0 %v2867_v17  ;;  %2458 = vmatprep.subr.bf16.mxu1 %v2867_v17  ;;  %v2990_v39 = vpack.c.bf16 %v69_v38, %v68_v37  ;;  %v3007_v45 = vrot.slane %v78_v44, %v87_v43  ;;  %v80_v50 = vld [vmem:[%s3329_s4] sm:$0x3]  ;;  %v3040_v7 = vrot.slane %v78_v44, %v91_v5  ;;  %s1939_s4 = sshll.u32 %s2873_s2, 4  ;;  %s1940_s4 = int_to_ptr.vmem [resolvable:$true] %s1939_s4 }
  0x32   :  { %s2808_s30 = scalar_lea.vmem %s1940_s4, 32  ;;  %p2813_p3 = scmp.lt.s32.totalorder %s1940_s4, %s1940_s4 }
  0x33   :  { %1954 = vmatmul.mubr.msk.f32.vlgmr.msra.gmra.mrb[0].mxu0 %vm95_vm0, %v79_v15  ;;  %p2809_p2 = scmp.ne.s32.totalorder %s1940_s4, %s2808_s30  ;;  %p2814_p4 = scmp.lt.s32.totalorder %s2808_s30, %s2808_s30 }
  0x34   :  { %2428 = vmatpush3.bf16.msra.mxu0 %v2957_v16  ;;  %2170 = vmatprep.mubr.msk.f32.mxu0 %vm2868_vm1, %v2866_v0 }
  0x35   :  { %2429 = vmatprep.subr.bf16.mxu0 %v2867_v17  ;;  %p2815_p5 = por %p2814_p4, %p2813_p3 }
  0x37   :  { %p2816_p6 = pnand %p2815_p5, %p2809_p2 }
  0x38   :  { %2431 = vmatpush3.bf16.msra.mxu0 %v2964_v20 }
  0x39   :  { %2432 = vmatprep.subr.bf16.mxu0 %v2867_v17 }
  0x3c   :  { %2434 = vmatpush3.bf16.msra.mxu0 %v2970_v23 }
  0x3d   :  { %2435 = vmatprep.subr.bf16.mxu0 %v2867_v17 }
  0x40   :  { %2437 = vmatpush3.bf16.msra.mxu0 %v2974_v26 }
  0x41   :  { %2438 = vmatprep.subr.bf16.mxu0 %v2867_v17 }
  0x44   :  { %2440 = vmatpush3.bf16.msra.mxu0 %v2978_v29 }
  0x45   :  { %2441 = vmatprep.subr.bf16.mxu0 %v2867_v17 }
  0x48   :  { %2443 = vmatpush3.bf16.msra.mxu0 %v2982_v32 }
  0x49   :  { %2444 = vmatprep.subr.bf16.mxu0 %v2867_v17 }
  0x4c   :  { %2446 = vmatpush3.bf16.msra.mxu0 %v2986_v35 }
  0x4d   :  { %2447 = vmatprep.subr.bf16.mxu0 %v2867_v17 }
  0x50   :  { %2449 = vmatpush3.bf16.msra.mxu0 %v2990_v39 }
  0x51   :  { %2483 = vmatprep.subr.bf16.mxu0 %v2939_v4 }
  0x53   :  { %2171 = vmatmul.mubr.msk.f32.vlgmr.msra.gmra.mrb[0].mxu0 %vm81_vm2, %v2869_v41 }
  0x54   :  { %2485 = vmatpush1.bf16.msra.mxu0 %v2941_v8  ;;  %559 = vmatprep.mubr.f32.mxu0 %v2866_v0 }
  0x55   :  { %2487 = vmatprep.subr.bf16.mxu0 %v2943_v9 }
  0x58   :  { %2489 = vmatpush1.bf16.msra.mxu0 %v2948_v12 }
  0x59   :  { %2515 = vmatprep.subr.bf16.mxu0 %v2939_v4 }
 0x126   :  { %v235_v46 = vpop.f32.mrb[0].mxu0 }
 0x127   :  { %v2682_v47 = vadd.f32 %v235_v46, %v3007_v45  ;;  %v2172_v48 = vpop.f32.mrb[1].mxu0 }
 0x129   :  { %2700 = vtanh.f32 %v2682_v47  ;;  %v1956_v51 = vmul.f32 -1.442695, %v2682_v47 }
 0x12b   :  { %2702 = vpow2.f32 %v1956_v51 }
 0x133   :  { %v2701_v49 = vpop.eup %2700 }
 0x134   :  { %253 = vrot.lane.b32.xlu0 %v2701_v49, %s2870_s26 }
 0x135   :  { %v2703_v52 = vpop.eup %2702 }
 0x136   :  { %v243_v53 = vadd.f32 1.0, %v2703_v52 }
 0x138   :  { %248 = vrot.lane.b32.xlu0 %v80_v50, %s2871_s29  ;;  %2704 = vrcp.f32 %v243_v53 }
 0x142   :  { %v2705_v54 = vpop.eup %2704 }
 0x1a6   :  { %v254_v55 = vpop.permute.xlu0 %253 }
 0x1a7   :  { %v256_v56 = vmul.f32 %v2705_v54, %v254_v55 }
 0x1a9   :  { %258 = vrot.lane.b32.xlu1 %v256_v56, %s2871_s29 }
 0x1aa   :  { %v249_v57 = vpop.permute.xlu0 %248 }
 0x1ab   :  { %v251_v58 = vmul.f32 %v2705_v54, %v249_v57 }
 0x21b   :  { %v259_v59 = vpop.permute.xlu1 %258 }
 0x21c   :  { %v3016_v60 = vadd.f32 %v259_v59, %v251_v58 }
 0x21e   :  { %2706 = vtanh.f32 %v3016_v60 }
 0x228   :  { %v2707_v61 = vpop.eup %2706 }
 0x229   :  { %264 = vrot.lane.b32.xlu1 %v2707_v61, %s2870_s26 }
 0x29b   :  { %v265_v62 = vpop.permute.xlu1 %264 }
 0x29c   :  { %v267_v63 = vmul.f32 %v2705_v54, %v265_v62 }
 0x29e   :  { %269 = vrot.lane.b32.xlu0 %v267_v63, %s2871_s29 }
 0x310   :  { %v270_v1 = vpop.permute.xlu0 %269 }
 0x311   :  { %1957 = vmatmul.mubr.msk.f32.vlgmr.msra.gmra.mrb[0].mxu1 %vm95_vm0, %v270_v1 }
 0x312   :  { %2460 = vmatpush3.bf16.msra.mxu1 %v2957_v16  ;;  %2205 = vmatprep.mubr.msk.f32.mxu1 %vm2868_vm1, %v2866_v0 }
 0x313   :  { %2461 = vmatprep.subr.bf16.mxu1 %v2867_v17 }
 0x316   :  { %2463 = vmatpush3.bf16.msra.mxu1 %v2964_v20 }
 0x317   :  { %2464 = vmatprep.subr.bf16.mxu1 %v2867_v17 }
 0x31a   :  { %2466 = vmatpush3.bf16.msra.mxu1 %v2970_v23 }
 0x31b   :  { %2467 = vmatprep.subr.bf16.mxu1 %v2867_v17 }
 0x31e   :  { %2469 = vmatpush3.bf16.msra.mxu1 %v2974_v26 }
 0x31f   :  { %2470 = vmatprep.subr.bf16.mxu1 %v2867_v17 }
 0x322   :  { %2472 = vmatpush3.bf16.msra.mxu1 %v2978_v29 }
 0x323   :  { %2473 = vmatprep.subr.bf16.mxu1 %v2867_v17 }
 0x326   :  { %2475 = vmatpush3.bf16.msra.mxu1 %v2982_v32 }
 0x327   :  { %2476 = vmatprep.subr.bf16.mxu1 %v2867_v17 }
 0x32a   :  { %2478 = vmatpush3.bf16.msra.mxu1 %v2986_v35 }
 0x32b   :  { %2479 = vmatprep.subr.bf16.mxu1 %v2867_v17 }
 0x32e   :  { %2481 = vmatpush3.bf16.msra.mxu1 %v2990_v39 }
 0x32f   :  { %2490 = vmatprep.subr.bf16.mxu1 %v2867_v17 }
 0x3e4   :  { %v339_v10 = vpop.f32.mrb[0].mxu1 }
 0x3e5   :  { %v341_v13 = vpop.f32.mrb[1].mxu1  ;;  %v340_v43 = vadd.f32 %v339_v10, %v3007_v45 }
 0x3e6   :  { %v342_v14 = vadd.f32 %v341_v13, %v3040_v7 }
 0x3e8   :  { %v351_v15 = vrot.slane %v342_v14, %v3042_v11  ;;  %v372_v18 = vsel %vm371_vm3, %v342_v14, -inf }
 0x3e9   :  { %373 = vmax.xlane.f32.xlu1 %v372_v18 }
 0x3ea   :  { %v352_v19 = vcombine.high %v351_v15, %v351_v15  ;;  %1958 = vst.sshfl [vmem:[#allocation7] sm:$0x1 pattern:$0x73625140] %v351_v15 }
 0x3ec   :  { %1959 = vst.sshfl [vmem:[#allocation7 + $0x8] sm:$0x1 pattern:$0x73625140] %v352_v19 }
 0x476   :  { %v374_v21 = vpop.xlane.xlu1 %373 }
 0x477   :  { %vm375_vm4 = vcmp.eq.f32.partialorder %v342_v14, %v374_v21 }
 0x478   :  { %v376_v22 = vsel %vm375_vm4, %v2992_v40, 128 }
 0x479   :  { %v377_v24 = vsel %vm371_vm3, %v376_v22, 2147483647 }
 0x47a   :  { %v379_v25 = vshra.s32 %v377_v24, 16  ;;  %v378_v28 = vand.u32 65535, %v377_v24 }
 0x47c   :  { %v381_v27 = vcvt.s32.f32 %v379_v25  ;;  %v380_v31 = vcvt.s32.f32 %v378_v28 }
 0x47e   :  { %382 = vmin.xlane.f32.xlu0 %v381_v27 }
 0x50b   :  { %v383_v30 = vpop.xlane.xlu0 %382 }
 0x50c   :  { %vm384_vm5 = vcmp.eq.f32.partialorder %v381_v27, %v383_v30  ;;  %v389_v34 = vcvt.f32.s32 %v383_v30 }
 0x50d   :  { %v385_v33 = vsel %vm384_vm5, %v380_v31, inf }
 0x50e   :  { %386 = vmin.xlane.f32.xlu0 %v385_v33  ;;  %v390_v37 = vshll.u32 %v389_v34, 16 }
 0x59b   :  { %v387_v36 = vpop.xlane.xlu0 %386 }
 0x59c   :  { %v388_v38 = vcvt.f32.s32 %v387_v36 }
 0x59e   :  { %v391_v42 = vadd.s32 %v390_v37, %v388_v38 }
 0x5a0   :  { %vm392_vm6 = vcmp.eq.s32.totalorder %v2992_v40, %v391_v42 }
 0x5a1   :  { %2206 = vmatmul.mubr.msk.f32.vlgmr.msra.gmra.mrb[2].mxu1 %vm392_vm6, %v2869_v41 }
 0x5a2   :  { %2492 = vmatpush3.bf16.msra.mxu1 %v2957_v16  ;;  %2240 = vmatprep.mubr.msk.f32.mxu1 %vm2868_vm1, %v2866_v0 }
 0x5a3   :  { %2493 = vmatprep.subr.bf16.mxu1 %v2867_v17 }
 0x5a6   :  { %2495 = vmatpush3.bf16.msra.mxu1 %v2964_v20 }
 0x5a7   :  { %2496 = vmatprep.subr.bf16.mxu1 %v2867_v17 }
 0x5aa   :  { %2498 = vmatpush3.bf16.msra.mxu1 %v2970_v23 }
 0x5ab   :  { %2499 = vmatprep.subr.bf16.mxu1 %v2867_v17 }
 0x5ae   :  { %2501 = vmatpush3.bf16.msra.mxu1 %v2974_v26 }
 0x5af   :  { %2502 = vmatprep.subr.bf16.mxu1 %v2867_v17 }
 0x5b2   :  { %2504 = vmatpush3.bf16.msra.mxu1 %v2978_v29 }
 0x5b3   :  { %2505 = vmatprep.subr.bf16.mxu1 %v2867_v17 }
 0x5b6   :  { %2507 = vmatpush3.bf16.msra.mxu1 %v2982_v32 }
 0x5b7   :  { %2508 = vmatprep.subr.bf16.mxu1 %v2867_v17 }
 0x5ba   :  { %2510 = vmatpush3.bf16.msra.mxu1 %v2986_v35 }
 0x5bb   :  { %2511 = vmatprep.subr.bf16.mxu1 %v2867_v17 }
 0x5be   :  { %2513 = vmatpush3.bf16.msra.mxu1 %v2990_v39 }
 0x5bf   :  { %2547 = vmatprep.subr.bf16.mxu1 %v2939_v4 }
 0x674   :  { %v461_v44 = vpop.f32.mrb[2].mxu1 }
 0x675   :  { %v465_v46 = vadd.f32 %v461_v44, %v340_v43  ;;  %v2207_v47 = vpop.f32.mrb[3].mxu1 }
 0x677   :  { %2708 = vtanh.f32 %v465_v46  ;;  %v1962_v49 = vmul.f32 -1.442695, %v465_v46 }
 0x679   :  { %2710 = vpow2.f32 %v1962_v49 }
 0x681   :  { %v2709_v48 = vpop.eup %2708 }
 0x682   :  { %475 = vrot.lane.b32.xlu1 %v2709_v48, %s2870_s26 }
 0x683   :  { %v2711_v50 = vpop.eup %2710 }
 0x684   :  { %v469_v51 = vadd.f32 1.0, %v2711_v50 }
 0x686   :  { %2712 = vrcp.f32 %v469_v51 }
 0x690   :  { %v2713_v52 = vpop.eup %2712 }
 0x691   :  { %v473_v55 = vmul.f32 %v2713_v52, %v3016_v60 }
 0x6f4   :  { %v476_v53 = vpop.permute.xlu1 %475 }
 0x6f5   :  { %v478_v54 = vmul.f32 %v2713_v52, %v476_v53 }
 0x6f7   :  { %480 = vrot.lane.b32.xlu0 %v478_v54, %s2871_s29 }
 0x769   :  { %v481_v56 = vpop.permute.xlu0 %480 }
 0x76a   :  { %v3073_v57 = vadd.f32 %v481_v56, %v473_v55 }
 0x76c   :  { %2714 = vtanh.f32 %v3073_v57 }
 0x776   :  { %v2715_v58 = vpop.eup %2714 }
 0x777   :  { %486 = vrot.lane.b32.xlu1 %v2715_v58, %s2870_s26 }
 0x7e9   :  { %v487_v59 = vpop.permute.xlu1 %486 }
 0x7ea   :  { %v489_v61 = vmul.f32 %v2713_v52, %v487_v59 }
 0x7ec   :  { %491 = vrot.lane.b32.xlu1 %v489_v61, %s2871_s29 }
 0x85e   :  { %v492_v62 = vpop.permute.xlu1 %491 }
 0x85f   :  { %1963 = vmatmul.mubr.msk.f32.vlgmr.msra.gmra.mrb[2].mxu0 %vm95_vm0, %v492_v62 }
 0x860   :  { %2517 = vmatpush1.bf16.msra.mxu0 %v2941_v8  ;;  %780 = vmatprep.mubr.f32.mxu0 %v2866_v0 }
 0x861   :  { %2519 = vmatprep.subr.bf16.mxu0 %v2943_v9 }
 0x864   :  { %2521 = vmatpush1.bf16.msra.mxu0 %v2948_v12 }
 0x865   :  { %2522 = vmatprep.subr.bf16.mxu0 %v2867_v17 }
 0x932   :  { %v561_v60 = vpop.f32.mrb[2].mxu0 }
 0x933   :  { %v563_v63 = vpop.f32.mrb[3].mxu0  ;;  %v562_v31 = vadd.f32 %v561_v60, %v3007_v45 }
 0x934   :  { %v564_v1 = vadd.f32 %v563_v63, %v3040_v7 }
 0x936   :  { %v573_v2 = vrot.slane %v564_v1, %v3042_v11  ;;  %v593_v3 = vsel %vm371_vm3, %v564_v1, -inf }
 0x937   :  { %594 = vmax.xlane.f32.xlu0 %v593_v3 }
 0x938   :  { %v574_v5 = vcombine.high %v573_v2, %v573_v2  ;;  %1964 = vst.sshfl [vmem:[#allocation7 + $0x1] sm:$0x1 pattern:$0x73625140] %v573_v2 }
 0x93a   :  { %1965 = vst.sshfl [vmem:[#allocation7 + $0x9] sm:$0x1 pattern:$0x73625140] %v574_v5 }
 0x9c4   :  { %v595_v6 = vpop.xlane.xlu0 %594 }
 0x9c5   :  { %vm596_vm7 = vcmp.eq.f32.partialorder %v564_v1, %v595_v6 }
 0x9c6   :  { %v597_v10 = vsel %vm596_vm7, %v2992_v40, 128 }
 0x9c7   :  { %v598_v13 = vsel %vm371_vm3, %v597_v10, 2147483647 }
 0x9c8   :  { %v600_v14 = vshra.s32 %v598_v13, 16  ;;  %v599_v18 = vand.u32 65535, %v598_v13 }
 0x9ca   :  { %v602_v15 = vcvt.s32.f32 %v600_v14  ;;  %v601_v21 = vcvt.s32.f32 %v599_v18 }
 0x9cc   :  { %603 = vmin.xlane.f32.xlu1 %v602_v15 }
 0xa59   :  { %v604_v19 = vpop.xlane.xlu1 %603 }
 0xa5a   :  { %vm605_vm8 = vcmp.eq.f32.partialorder %v602_v15, %v604_v19  ;;  %v610_v24 = vcvt.f32.s32 %v604_v19 }
 0xa5b   :  { %v606_v22 = vsel %vm605_vm8, %v601_v21, inf }
 0xa5c   :  { %607 = vmin.xlane.f32.xlu0 %v606_v22  ;;  %v611_v27 = vshll.u32 %v610_v24, 16 }
 0xae9   :  { %v608_v25 = vpop.xlane.xlu0 %607 }
 0xaea   :  { %v609_v28 = vcvt.f32.s32 %v608_v25 }
 0xaec   :  { %v612_v30 = vadd.s32 %v611_v27, %v609_v28 }
 0xaee   :  { %vm613_vm9 = vcmp.eq.s32.totalorder %v2992_v40, %v612_v30 }
 0xaef   :  { %2241 = vmatmul.mubr.msk.f32.vlgmr.msra.gmra.mrb[4].mxu1 %vm613_vm9, %v2869_v41 }
 0xaf0   :  { %2549 = vmatpush1.bf16.msra.mxu1 %v2941_v8  ;;  %1001 = vmatprep.mubr.f32.mxu1 %v2866_v0 }
 0xaf1   :  { %2551 = vmatprep.subr.bf16.mxu1 %v2943_v9 }
 0xaf4   :  { %2553 = vmatpush1.bf16.msra.mxu1 %v2948_v12 }
 0xaf5   :  { %2554 = vmatprep.subr.bf16.mxu1 %v2867_v17 }
 0xbc2   :  { %v682_v33 = vpop.f32.mrb[4].mxu1 }
 0xbc3   :  { %v686_v34 = vadd.f32 %v682_v33, %v562_v31  ;;  %v2242_v36 = vpop.f32.mrb[5].mxu1 }
 0xbc5   :  { %2716 = vtanh.f32 %v686_v34  ;;  %v1968_v38 = vmul.f32 -1.442695, %v686_v34 }
 0xbc7   :  { %2718 = vpow2.f32 %v1968_v38 }
 0xbcf   :  { %v2717_v37 = vpop.eup %2716 }
 0xbd0   :  { %696 = vrot.lane.b32.xlu0 %v2717_v37, %s2870_s26 }
 0xbd1   :  { %v2719_v42 = vpop.eup %2718 }
 0xbd2   :  { %v690_v43 = vadd.f32 1.0, %v2719_v42 }
 0xbd4   :  { %2720 = vrcp.f32 %v690_v43 }
 0xbde   :  { %v2721_v44 = vpop.eup %2720 }
 0xbdf   :  { %v694_v48 = vmul.f32 %v2721_v44, %v3073_v57 }
 0xc42   :  { %v697_v46 = vpop.permute.xlu0 %696 }
 0xc43   :  { %v699_v47 = vmul.f32 %v2721_v44, %v697_v46 }
 0xc45   :  { %701 = vrot.lane.b32.xlu1 %v699_v47, %s2871_s29 }
 0xcb7   :  { %v702_v49 = vpop.permute.xlu1 %701 }
 0xcb8   :  { %v3100_v50 = vadd.f32 %v702_v49, %v694_v48 }
 0xcba   :  { %2722 = vtanh.f32 %v3100_v50 }
 0xcc4   :  { %v2723_v51 = vpop.eup %2722 }
 0xcc5   :  { %707 = vrot.lane.b32.xlu1 %v2723_v51, %s2870_s26 }
 0xd37   :  { %v708_v52 = vpop.permute.xlu1 %707 }
 0xd38   :  { %v710_v53 = vmul.f32 %v2721_v44, %v708_v52 }
 0xd3a   :  { %712 = vrot.lane.b32.xlu0 %v710_v53, %s2871_s29 }
 0xdac   :  { %v713_v54 = vpop.permute.xlu0 %712 }
 0xdad   :  { %1969 = vmatmul.mubr.msk.f32.vlgmr.msra.gmra.mrb[4].mxu0 %vm95_vm0, %v713_v54 }
 0xdae   :  { %2524 = vmatpush3.bf16.msra.mxu0 %v2957_v16  ;;  %2275 = vmatprep.mubr.msk.f32.mxu0 %vm2868_vm1, %v2866_v0 }
 0xdaf   :  { %2525 = vmatprep.subr.bf16.mxu0 %v2867_v17 }
 0xdb2   :  { %2527 = vmatpush3.bf16.msra.mxu0 %v2964_v20 }
 0xdb3   :  { %2528 = vmatprep.subr.bf16.mxu0 %v2867_v17 }
 0xdb6   :  { %2530 = vmatpush3.bf16.msra.mxu0 %v2970_v23 }
 0xdb7   :  { %2531 = vmatprep.subr.bf16.mxu0 %v2867_v17 }
 0xdba   :  { %2533 = vmatpush3.bf16.msra.mxu0 %v2974_v26 }
 0xdbb   :  { %2534 = vmatprep.subr.bf16.mxu0 %v2867_v17 }
 0xdbe   :  { %2536 = vmatpush3.bf16.msra.mxu0 %v2978_v29 }
 0xdbf   :  { %2537 = vmatprep.subr.bf16.mxu0 %v2867_v17 }
 0xdc2   :  { %2539 = vmatpush3.bf16.msra.mxu0 %v2982_v32 }
 0xdc3   :  { %2540 = vmatprep.subr.bf16.mxu0 %v2867_v17 }
 0xdc6   :  { %2542 = vmatpush3.bf16.msra.mxu0 %v2986_v35 }
 0xdc7   :  { %2543 = vmatprep.subr.bf16.mxu0 %v2867_v17 }
 0xdca   :  { %2545 = vmatpush3.bf16.msra.mxu0 %v2990_v39 }
 0xdcb   :  { %2579 = vmatprep.subr.bf16.mxu0 %v2939_v4 }
 0xe80   :  { %v782_v55 = vpop.f32.mrb[4].mxu0 }
 0xe81   :  { %v784_v56 = vpop.f32.mrb[5].mxu0  ;;  %v783_v21 = vadd.f32 %v782_v55, %v3007_v45 }
 0xe82   :  { %v785_v57 = vadd.f32 %v784_v56, %v3040_v7 }
 0xe84   :  { %v794_v58 = vrot.slane %v785_v57, %v3042_v11  ;;  %v814_v59 = vsel %vm371_vm3, %v785_v57, -inf }
 0xe85   :  { %815 = vmax.xlane.f32.xlu1 %v814_v59 }
 0xe86   :  { %v795_v61 = vcombine.high %v794_v58, %v794_v58  ;;  %1970 = vst.sshfl [vmem:[#allocation7 + $0x2] sm:$0x1 pattern:$0x73625140] %v794_v58 }
 0xe88   :  { %1971 = vst.sshfl [vmem:[#allocation7 + $0xa] sm:$0x1 pattern:$0x73625140] %v795_v61 }
 0xf12   :  { %v816_v62 = vpop.xlane.xlu1 %815 }
 0xf13   :  { %vm817_vm10 = vcmp.eq.f32.partialorder %v785_v57, %v816_v62 }
 0xf14   :  { %v818_v60 = vsel %vm817_vm10, %v2992_v40, 128 }
 0xf15   :  { %v819_v63 = vsel %vm371_vm3, %v818_v60, 2147483647 }
 0xf16   :  { %v821_v1 = vshra.s32 %v819_v63, 16  ;;  %v820_v3 = vand.u32 65535, %v819_v63 }
 0xf18   :  { %v823_v2 = vcvt.s32.f32 %v821_v1  ;;  %v822_v6 = vcvt.s32.f32 %v820_v3 }
 0xf1a   :  { %824 = vmin.xlane.f32.xlu0 %v823_v2 }
 0xfa7   :  { %v825_v5 = vpop.xlane.xlu0 %824 }
 0xfa8   :  { %vm826_vm11 = vcmp.eq.f32.partialorder %v823_v2, %v825_v5  ;;  %v831_v13 = vcvt.f32.s32 %v825_v5 }
 0xfa9   :  { %v827_v10 = vsel %vm826_vm11, %v822_v6, inf }
 0xfaa   :  { %828 = vmin.xlane.f32.xlu0 %v827_v10  ;;  %v832_v15 = vshll.u32 %v831_v13, 16 }
0x1037   :  { %v829_v14 = vpop.xlane.xlu0 %828 }
0x1038   :  { %v830_v18 = vcvt.f32.s32 %v829_v14 }
0x103a   :  { %v833_v19 = vadd.s32 %v832_v15, %v830_v18 }
0x103c   :  { %vm834_vm12 = vcmp.eq.s32.totalorder %v2992_v40, %v833_v19 }
0x103d   :  { %2276 = vmatmul.mubr.msk.f32.vlgmr.msra.gmra.mrb[6].mxu0 %vm834_vm12, %v2869_v41 }
0x103e   :  { %2581 = vmatpush1.bf16.msra.mxu0 %v2941_v8  ;;  %1222 = vmatprep.mubr.f32.mxu0 %v2866_v0 }
0x103f   :  { %2583 = vmatprep.subr.bf16.mxu0 %v2943_v9 }
0x1042   :  { %2585 = vmatpush1.bf16.msra.mxu0 %v2948_v12 }
0x1043   :  { %2586 = vmatprep.subr.bf16.mxu0 %v2867_v17 }
0x1110   :  { %v903_v22 = vpop.f32.mrb[6].mxu0 }
0x1111   :  { %v907_v24 = vadd.f32 %v903_v22, %v783_v21  ;;  %v2277_v25 = vpop.f32.mrb[7].mxu0 }
0x1113   :  { %2724 = vtanh.f32 %v907_v24  ;;  %v1974_v28 = vmul.f32 -1.442695, %v907_v24 }
0x1115   :  { %2726 = vpow2.f32 %v1974_v28 }
0x111d   :  { %v2725_v27 = vpop.eup %2724 }
0x111e   :  { %917 = vrot.lane.b32.xlu1 %v2725_v27, %s2870_s26 }
0x111f   :  { %v2727_v30 = vpop.eup %2726 }
0x1120   :  { %v911_v31 = vadd.f32 1.0, %v2727_v30 }
0x1122   :  { %2728 = vrcp.f32 %v911_v31 }
0x112c   :  { %v2729_v33 = vpop.eup %2728 }
0x112d   :  { %v915_v37 = vmul.f32 %v2729_v33, %v3100_v50 }
0x1190   :  { %v918_v34 = vpop.permute.xlu1 %917 }
0x1191   :  { %v920_v36 = vmul.f32 %v2729_v33, %v918_v34 }
0x1193   :  { %922 = vrot.lane.b32.xlu0 %v920_v36, %s2871_s29 }
0x1205   :  { %v923_v38 = vpop.permute.xlu0 %922 }
0x1206   :  { %v3140_v42 = vadd.f32 %v923_v38, %v915_v37 }
0x1208   :  { %2730 = vtanh.f32 %v3140_v42 }
0x1212   :  { %v2731_v43 = vpop.eup %2730 }
0x1213   :  { %928 = vrot.lane.b32.xlu1 %v2731_v43, %s2870_s26 }
0x1285   :  { %v929_v44 = vpop.permute.xlu1 %928 }
0x1286   :  { %v931_v46 = vmul.f32 %v2729_v33, %v929_v44 }
0x1288   :  { %933 = vrot.lane.b32.xlu1 %v931_v46, %s2871_s29 }
0x12fa   :  { %v934_v47 = vpop.permute.xlu1 %933 }
0x12fb   :  { %1975 = vmatmul.mubr.msk.f32.vlgmr.msra.gmra.mrb[6].mxu1 %vm95_vm0, %v934_v47 }
0x12fc   :  { %2556 = vmatpush3.bf16.msra.mxu1 %v2957_v16  ;;  %2310 = vmatprep.mubr.msk.f32.mxu1 %vm2868_vm1, %v2866_v0 }
0x12fd   :  { %2557 = vmatprep.subr.bf16.mxu1 %v2867_v17 }
0x1300   :  { %2559 = vmatpush3.bf16.msra.mxu1 %v2964_v20 }
0x1301   :  { %2560 = vmatprep.subr.bf16.mxu1 %v2867_v17 }
0x1304   :  { %2562 = vmatpush3.bf16.msra.mxu1 %v2970_v23 }
0x1305   :  { %2563 = vmatprep.subr.bf16.mxu1 %v2867_v17 }
0x1308   :  { %2565 = vmatpush3.bf16.msra.mxu1 %v2974_v26 }
0x1309   :  { %2566 = vmatprep.subr.bf16.mxu1 %v2867_v17 }
0x130c   :  { %2568 = vmatpush3.bf16.msra.mxu1 %v2978_v29 }
0x130d   :  { %2569 = vmatprep.subr.bf16.mxu1 %v2867_v17 }
0x1310   :  { %2571 = vmatpush3.bf16.msra.mxu1 %v2982_v32 }
0x1311   :  { %2572 = vmatprep.subr.bf16.mxu1 %v2867_v17 }
0x1314   :  { %2574 = vmatpush3.bf16.msra.mxu1 %v2986_v35 }
0x1315   :  { %2575 = vmatprep.subr.bf16.mxu1 %v2867_v17 }
0x1318   :  { %2577 = vmatpush3.bf16.msra.mxu1 %v2990_v39 }
0x1319   :  { %2611 = vmatprep.subr.bf16.mxu1 %v2939_v4 }
0x13ce   :  { %v1003_v48 = vpop.f32.mrb[6].mxu1 }
0x13cf   :  { %v1005_v49 = vpop.f32.mrb[7].mxu1  ;;  %v1004_v6 = vadd.f32 %v1003_v48, %v3007_v45 }
0x13d0   :  { %v1006_v50 = vadd.f32 %v1005_v49, %v3040_v7 }
0x13d2   :  { %v1015_v51 = vrot.slane %v1006_v50, %v3042_v11  ;;  %v1035_v52 = vsel %vm371_vm3, %v1006_v50, -inf }
0x13d3   :  { %1036 = vmax.xlane.f32.xlu0 %v1035_v52 }
0x13d4   :  { %v1016_v53 = vcombine.high %v1015_v51, %v1015_v51  ;;  %1976 = vst.sshfl [vmem:[#allocation7 + $0x3] sm:$0x1 pattern:$0x73625140] %v1015_v51 }
0x13d6   :  { %1977 = vst.sshfl [vmem:[#allocation7 + $0xb] sm:$0x1 pattern:$0x73625140] %v1016_v53 }
0x1460   :  { %v1037_v54 = vpop.xlane.xlu0 %1036 }
0x1461   :  { %vm1038_vm13 = vcmp.eq.f32.partialorder %v1006_v50, %v1037_v54 }
0x1462   :  { %v1039_v55 = vsel %vm1038_vm13, %v2992_v40, 128 }
0x1463   :  { %v1040_v56 = vsel %vm371_vm3, %v1039_v55, 2147483647 }
0x1464   :  { %v1042_v57 = vshra.s32 %v1040_v56, 16  ;;  %v1041_v59 = vand.u32 65535, %v1040_v56 }
0x1466   :  { %v1044_v58 = vcvt.s32.f32 %v1042_v57  ;;  %v1043_v62 = vcvt.s32.f32 %v1041_v59 }
0x1468   :  { %1045 = vmin.xlane.f32.xlu1 %v1044_v58 }
0x14f5   :  { %v1046_v61 = vpop.xlane.xlu1 %1045 }
0x14f6   :  { %vm1047_vm14 = vcmp.eq.f32.partialorder %v1044_v58, %v1046_v61  ;;  %v1052_v63 = vcvt.f32.s32 %v1046_v61 }
0x14f7   :  { %v1048_v60 = vsel %vm1047_vm14, %v1043_v62, inf }
0x14f8   :  { %1049 = vmin.xlane.f32.xlu0 %v1048_v60  ;;  %v1053_v2 = vshll.u32 %v1052_v63, 16 }
0x1585   :  { %v1050_v1 = vpop.xlane.xlu0 %1049 }
0x1586   :  { %v1051_v3 = vcvt.f32.s32 %v1050_v1 }
0x1588   :  { %v1054_v5 = vadd.s32 %v1053_v2, %v1051_v3 }
0x158a   :  { %vm1055_vm15 = vcmp.eq.s32.totalorder %v2992_v40, %v1054_v5 }
0x158b   :  { %2311 = vmatmul.mubr.msk.f32.vlgmr.msra.gmra.mrb[8].mxu1 %vm1055_vm15, %v2869_v41 }
0x158c   :  { %2613 = vmatpush1.bf16.msra.mxu1 %v2941_v8  ;;  %1443 = vmatprep.mubr.f32.mxu1 %v2866_v0 }
0x158d   :  { %2615 = vmatprep.subr.bf16.mxu1 %v2943_v9 }
0x1590   :  { %2617 = vmatpush1.bf16.msra.mxu1 %v2948_v12 }
0x1591   :  { %2618 = vmatprep.subr.bf16.mxu1 %v2867_v17 }
0x165e   :  { %v1124_v10 = vpop.f32.mrb[8].mxu1 }
0x165f   :  { %v1128_v13 = vadd.f32 %v1124_v10, %v1004_v6  ;;  %v2312_v14 = vpop.f32.mrb[9].mxu1 }
0x1661   :  { %2732 = vtanh.f32 %v1128_v13  ;;  %v1980_v18 = vmul.f32 -1.442695, %v1128_v13 }
0x1663   :  { %2734 = vpow2.f32 %v1980_v18 }
0x166b   :  { %v2733_v15 = vpop.eup %2732 }
0x166c   :  { %1138 = vrot.lane.b32.xlu0 %v2733_v15, %s2870_s26 }
0x166d   :  { %v2735_v19 = vpop.eup %2734 }
0x166e   :  { %v1132_v21 = vadd.f32 1.0, %v2735_v19 }
0x1670   :  { %2736 = vrcp.f32 %v1132_v21 }
0x167a   :  { %v2737_v22 = vpop.eup %2736 }
0x167b   :  { %v1136_v27 = vmul.f32 %v2737_v22, %v3140_v42 }
0x16de   :  { %v1139_v24 = vpop.permute.xlu0 %1138 }
0x16df   :  { %v1141_v25 = vmul.f32 %v2737_v22, %v1139_v24 }
0x16e1   :  { %1143 = vrot.lane.b32.xlu1 %v1141_v25, %s2871_s29 }
0x1753   :  { %v1144_v28 = vpop.permute.xlu1 %1143 }
0x1754   :  { %v3180_v30 = vadd.f32 %v1144_v28, %v1136_v27 }
0x1756   :  { %2738 = vtanh.f32 %v3180_v30 }
0x1760   :  { %v2739_v31 = vpop.eup %2738 }
0x1761   :  { %1149 = vrot.lane.b32.xlu1 %v2739_v31, %s2870_s26 }
0x17d3   :  { %v1150_v33 = vpop.permute.xlu1 %1149 }
0x17d4   :  { %v1152_v34 = vmul.f32 %v2737_v22, %v1150_v33 }
0x17d6   :  { %1154 = vrot.lane.b32.xlu0 %v1152_v34, %s2871_s29 }
0x1848   :  { %v1155_v36 = vpop.permute.xlu0 %1154 }
0x1849   :  { %1981 = vmatmul.mubr.msk.f32.vlgmr.msra.gmra.mrb[8].mxu0 %vm95_vm0, %v1155_v36 }
0x184a   :  { %2588 = vmatpush3.bf16.msra.mxu0 %v2957_v16  ;;  %2345 = vmatprep.mubr.msk.f32.mxu0 %vm2868_vm1, %v2866_v0 }
0x184b   :  { %2589 = vmatprep.subr.bf16.mxu0 %v2867_v17 }
0x184e   :  { %2591 = vmatpush3.bf16.msra.mxu0 %v2964_v20 }
0x184f   :  { %2592 = vmatprep.subr.bf16.mxu0 %v2867_v17 }
0x1852   :  { %2594 = vmatpush3.bf16.msra.mxu0 %v2970_v23 }
0x1853   :  { %2595 = vmatprep.subr.bf16.mxu0 %v2867_v17 }
0x1856   :  { %2597 = vmatpush3.bf16.msra.mxu0 %v2974_v26 }
0x1857   :  { %2598 = vmatprep.subr.bf16.mxu0 %v2867_v17 }
0x185a   :  { %2600 = vmatpush3.bf16.msra.mxu0 %v2978_v29 }
0x185b   :  { %2601 = vmatprep.subr.bf16.mxu0 %v2867_v17 }
0x185e   :  { %2603 = vmatpush3.bf16.msra.mxu0 %v2982_v32 }
0x185f   :  { %2604 = vmatprep.subr.bf16.mxu0 %v2867_v17 }
0x1862   :  { %2606 = vmatpush3.bf16.msra.mxu0 %v2986_v35 }
0x1863   :  { %2607 = vmatprep.subr.bf16.mxu0 %v2867_v17 }
0x1866   :  { %2609 = vmatpush3.bf16.msra.mxu0 %v2990_v39 }
0x1867   :  { %2643 = vmatprep.subr.bf16.mxu0 %v2939_v4 }
0x191c   :  { %v1224_v37 = vpop.f32.mrb[8].mxu0 }
0x191d   :  { %v1226_v38 = vpop.f32.mrb[9].mxu0  ;;  %v1225_v62 = vadd.f32 %v1224_v37, %v3007_v45 }
0x191e   :  { %v1227_v42 = vadd.f32 %v1226_v38, %v3040_v7 }
0x1920   :  { %v1236_v43 = vrot.slane %v1227_v42, %v3042_v11  ;;  %v1256_v44 = vsel %vm371_vm3, %v1227_v42, -inf }
0x1921   :  { %1257 = vmax.xlane.f32.xlu1 %v1256_v44 }
0x1922   :  { %v1237_v46 = vcombine.high %v1236_v43, %v1236_v43  ;;  %1982 = vst.sshfl [vmem:[#allocation7 + $0x4] sm:$0x1 pattern:$0x73625140] %v1236_v43 }
0x1924   :  { %1983 = vst.sshfl [vmem:[#allocation7 + $0xc] sm:$0x1 pattern:$0x73625140] %v1237_v46 }
0x19ae   :  { %v1258_v47 = vpop.xlane.xlu1 %1257 }
0x19af   :  { %vm1259_vm2 = vcmp.eq.f32.partialorder %v1227_v42, %v1258_v47 }
0x19b0   :  { %v1260_v48 = vsel %vm1259_vm2, %v2992_v40, 128 }
0x19b1   :  { %v1261_v49 = vsel %vm371_vm3, %v1260_v48, 2147483647 }
0x19b2   :  { %v1263_v50 = vshra.s32 %v1261_v49, 16  ;;  %v1262_v52 = vand.u32 65535, %v1261_v49 }
0x19b4   :  { %v1265_v51 = vcvt.s32.f32 %v1263_v50  ;;  %v1264_v54 = vcvt.s32.f32 %v1262_v52 }
0x19b6   :  { %1266 = vmin.xlane.f32.xlu0 %v1265_v51 }
0x1a43   :  { %v1267_v53 = vpop.xlane.xlu0 %1266 }
0x1a44   :  { %vm1268_vm4 = vcmp.eq.f32.partialorder %v1265_v51, %v1267_v53  ;;  %v1273_v56 = vcvt.f32.s32 %v1267_v53 }
0x1a45   :  { %v1269_v55 = vsel %vm1268_vm4, %v1264_v54, inf }
0x1a46   :  { %1270 = vmin.xlane.f32.xlu0 %v1269_v55  ;;  %v1274_v58 = vshll.u32 %v1273_v56, 16 }
0x1ad3   :  { %v1271_v57 = vpop.xlane.xlu0 %1270 }
0x1ad4   :  { %v1272_v59 = vcvt.f32.s32 %v1271_v57 }
0x1ad6   :  { %v1275_v61 = vadd.s32 %v1274_v58, %v1272_v59 }
0x1ad8   :  { %vm1276_vm5 = vcmp.eq.s32.totalorder %v2992_v40, %v1275_v61 }
0x1ad9   :  { %2346 = vmatmul.mubr.msk.f32.vlgmr.msra.gmra.mrb[10].mxu0 %vm1276_vm5, %v2869_v41 }
0x1ada   :  { %2645 = vmatpush1.bf16.msra.mxu0 %v2941_v8  ;;  %1664 = vmatprep.mubr.f32.mxu0 %v2866_v0 }
0x1adb   :  { %2647 = vmatprep.subr.bf16.mxu0 %v2943_v9 }
0x1ade   :  { %2649 = vmatpush1.bf16.msra.mxu0 %v2948_v12 }
0x1adf   :  { %2650 = vmatprep.subr.bf16.mxu0 %v2867_v17 }
0x1bac   :  { %v1345_v60 = vpop.f32.mrb[10].mxu0 }
0x1bad   :  { %v1349_v63 = vadd.f32 %v1345_v60, %v1225_v62  ;;  %v2347_v1 = vpop.f32.mrb[11].mxu0 }
0x1baf   :  { %2740 = vtanh.f32 %v1349_v63  ;;  %v1986_v3 = vmul.f32 -1.442695, %v1349_v63 }
0x1bb1   :  { %2742 = vpow2.f32 %v1986_v3 }
0x1bb9   :  { %v2741_v2 = vpop.eup %2740 }
0x1bba   :  { %1359 = vrot.lane.b32.xlu1 %v2741_v2, %s2870_s26 }
0x1bbb   :  { %v2743_v5 = vpop.eup %2742 }
0x1bbc   :  { %v1353_v6 = vadd.f32 1.0, %v2743_v5 }
0x1bbe   :  { %2744 = vrcp.f32 %v1353_v6 }
0x1bc8   :  { %v2745_v10 = vpop.eup %2744 }
0x1bc9   :  { %v1357_v15 = vmul.f32 %v2745_v10, %v3180_v30 }
0x1c2c   :  { %v1360_v13 = vpop.permute.xlu1 %1359 }
0x1c2d   :  { %v1362_v14 = vmul.f32 %v2745_v10, %v1360_v13 }
0x1c2f   :  { %1364 = vrot.lane.b32.xlu0 %v1362_v14, %s2871_s29 }
0x1ca1   :  { %v1365_v18 = vpop.permute.xlu0 %1364 }
0x1ca2   :  { %v3220_v19 = vadd.f32 %v1365_v18, %v1357_v15 }
0x1ca4   :  { %2746 = vtanh.f32 %v3220_v19 }
0x1cae   :  { %v2747_v21 = vpop.eup %2746 }
0x1caf   :  { %1370 = vrot.lane.b32.xlu1 %v2747_v21, %s2870_s26 }
0x1d21   :  { %v1371_v22 = vpop.permute.xlu1 %1370 }
0x1d22   :  { %v1373_v24 = vmul.f32 %v2745_v10, %v1371_v22 }
0x1d24   :  { %1375 = vrot.lane.b32.xlu1 %v1373_v24, %s2871_s29 }
0x1d96   :  { %v1376_v25 = vpop.permute.xlu1 %1375 }
0x1d97   :  { %1987 = vmatmul.mubr.msk.f32.vlgmr.msra.gmra.mrb[10].mxu1 %vm95_vm0, %v1376_v25 }
0x1d98   :  { %2620 = vmatpush3.bf16.msra.mxu1 %v2957_v16  ;;  %2380 = vmatprep.mubr.msk.f32.mxu1 %vm2868_vm1, %v2866_v0 }
0x1d99   :  { %2621 = vmatprep.subr.bf16.mxu1 %v2867_v17 }
0x1d9c   :  { %2623 = vmatpush3.bf16.msra.mxu1 %v2964_v20 }
0x1d9d   :  { %2624 = vmatprep.subr.bf16.mxu1 %v2867_v17 }
0x1da0   :  { %2626 = vmatpush3.bf16.msra.mxu1 %v2970_v23 }
0x1da1   :  { %2627 = vmatprep.subr.bf16.mxu1 %v2867_v17 }
0x1da4   :  { %2629 = vmatpush3.bf16.msra.mxu1 %v2974_v26 }
0x1da5   :  { %2630 = vmatprep.subr.bf16.mxu1 %v2867_v17 }
0x1da8   :  { %2632 = vmatpush3.bf16.msra.mxu1 %v2978_v29 }
0x1da9   :  { %2633 = vmatprep.subr.bf16.mxu1 %v2867_v17 }
0x1dac   :  { %2635 = vmatpush3.bf16.msra.mxu1 %v2982_v32 }
0x1dad   :  { %2636 = vmatprep.subr.bf16.mxu1 %v2867_v17 }
0x1db0   :  { %2638 = vmatpush3.bf16.msra.mxu1 %v2986_v35 }
0x1db1   :  { %2639 = vmatprep.subr.bf16.mxu1 %v2867_v17 }
0x1db4   :  { %2641 = vmatpush3.bf16.msra.mxu1 %v2990_v39 }
0x1db5   :  { %2675 = vmatprep.subr.bf16.mxu1 %v2939_v4 }
0x1e6a   :  { %v1445_v27 = vpop.f32.mrb[10].mxu1 }
0x1e6b   :  { %v1447_v28 = vpop.f32.mrb[11].mxu1  ;;  %v1446_v53 = vadd.f32 %v1445_v27, %v3007_v45 }
0x1e6c   :  { %v1448_v30 = vadd.f32 %v1447_v28, %v3040_v7 }
0x1e6e   :  { %v1457_v31 = vrot.slane %v1448_v30, %v3042_v11  ;;  %v1477_v33 = vsel %vm371_vm3, %v1448_v30, -inf }
0x1e6f   :  { %1478 = vmax.xlane.f32.xlu0 %v1477_v33 }
0x1e70   :  { %v1458_v34 = vcombine.high %v1457_v31, %v1457_v31  ;;  %1988 = vst.sshfl [vmem:[#allocation7 + $0x5] sm:$0x1 pattern:$0x73625140] %v1457_v31 }
0x1e72   :  { %1989 = vst.sshfl [vmem:[#allocation7 + $0xd] sm:$0x1 pattern:$0x73625140] %v1458_v34 }
0x1efc   :  { %v1479_v36 = vpop.xlane.xlu0 %1478 }
0x1efd   :  { %vm1480_vm6 = vcmp.eq.f32.partialorder %v1448_v30, %v1479_v36 }
0x1efe   :  { %v1481_v37 = vsel %vm1480_vm6, %v2992_v40, 128 }
0x1eff   :  { %v1482_v38 = vsel %vm371_vm3, %v1481_v37, 2147483647 }
0x1f00   :  { %v1484_v42 = vshra.s32 %v1482_v38, 16  ;;  %v1483_v43 = vand.u32 65535, %v1482_v38 }
0x1f02   :  { %v1486_v4 = vcvt.s32.f32 %v1484_v42  ;;  %v1485_v46 = vcvt.s32.f32 %v1483_v43 }
0x1f04   :  { %1487 = vmin.xlane.f32.xlu1 %v1486_v4 }
0x1f91   :  { %v1488_v44 = vpop.xlane.xlu1 %1487 }
0x1f92   :  { %vm1489_vm7 = vcmp.eq.f32.partialorder %v1486_v4, %v1488_v44  ;;  %v1494_v48 = vcvt.f32.s32 %v1488_v44 }
0x1f93   :  { %v1490_v47 = vsel %vm1489_vm7, %v1485_v46, inf }
0x1f94   :  { %1491 = vmin.xlane.f32.xlu0 %v1490_v47  ;;  %v1495_v50 = vshll.u32 %v1494_v48, 16 }
0x2021   :  { %v1492_v49 = vpop.xlane.xlu0 %1491 }
0x2022   :  { %v1493_v51 = vcvt.f32.s32 %v1492_v49 }
0x2024   :  { %v1496_v52 = vadd.s32 %v1495_v50, %v1493_v51 }
0x2026   :  { %vm1497_vm8 = vcmp.eq.s32.totalorder %v2992_v40, %v1496_v52 }
0x2027   :  { %2381 = vmatmul.mubr.msk.f32.vlgmr.msra.gmra.mrb[12].mxu1 %vm1497_vm8, %v2869_v41 }
0x2028   :  { %2677 = vmatpush1.bf16.msra.mxu1 %v2941_v8  ;;  %1885 = vmatprep.mubr.f32.mxu1 %v2866_v0 }
0x2029   :  { %2679 = vmatprep.subr.bf16.mxu1 %v2943_v9 }
0x202c   :  { %2681 = vmatpush1.bf16.msra.mxu1 %v2948_v12 }
0x20fa   :  { %v1566_v54 = vpop.f32.mrb[12].mxu1 }
0x20fb   :  { %v1570_v55 = vadd.f32 %v1566_v54, %v1446_v53  ;;  %v2382_v56 = vpop.f32.mrb[13].mxu1 }
0x20fd   :  { %2748 = vtanh.f32 %v1570_v55  ;;  %v1992_v58 = vmul.f32 -1.442695, %v1570_v55 }
0x20ff   :  { %2750 = vpow2.f32 %v1992_v58 }
0x2107   :  { %v2749_v57 = vpop.eup %2748 }
0x2108   :  { %1580 = vrot.lane.b32.xlu0 %v2749_v57, %s2870_s26 }
0x2109   :  { %v2751_v59 = vpop.eup %2750 }
0x210a   :  { %v1574_v61 = vadd.f32 1.0, %v2751_v59 }
0x210c   :  { %2752 = vrcp.f32 %v1574_v61 }
0x2116   :  { %v2753_v8 = vpop.eup %2752 }
0x2117   :  { %v1578_v9 = vmul.f32 %v2753_v8, %v3220_v19 }
0x217a   :  { %v1581_v62 = vpop.permute.xlu0 %1580 }
0x217b   :  { %v1583_v60 = vmul.f32 %v2753_v8, %v1581_v62 }
0x217d   :  { %1585 = vrot.lane.b32.xlu1 %v1583_v60, %s2871_s29 }
0x21ef   :  { %v1586_v12 = vpop.permute.xlu1 %1585 }
0x21f0   :  { %v3259_v63 = vadd.f32 %v1586_v12, %v1578_v9 }
0x21f2   :  { %2754 = vtanh.f32 %v3259_v63 }
0x21fc   :  { %v2755_v1 = vpop.eup %2754 }
0x21fd   :  { %1591 = vrot.lane.b32.xlu1 %v2755_v1, %s2870_s26 }
0x226f   :  { %v1592_v2 = vpop.permute.xlu1 %1591 }
0x2270   :  { %v1594_v3 = vmul.f32 %v2753_v8, %v1592_v2 }
0x2272   :  { %1596 = vrot.lane.b32.xlu0 %v1594_v3, %s2871_s29 }
0x22e4   :  { %v1597_v5 = vpop.permute.xlu0 %1596 }
0x22e5   :  { %1993 = vmatmul.mubr.msk.f32.vlgmr.msra.gmra.mrb[12].mxu0 %vm95_vm0, %v1597_v5 }
0x22e6   :  { %2652 = vmatpush3.bf16.msra.mxu0 %v2957_v16  ;;  %2415 = vmatprep.mubr.msk.f32.mxu0 %vm2868_vm1, %v2866_v0 }
0x22e7   :  { %2653 = vmatprep.subr.bf16.mxu0 %v2867_v17 }
0x22ea   :  { %2655 = vmatpush3.bf16.msra.mxu0 %v2964_v20 }
0x22eb   :  { %2656 = vmatprep.subr.bf16.mxu0 %v2867_v17 }
0x22ee   :  { %2658 = vmatpush3.bf16.msra.mxu0 %v2970_v23 }
0x22ef   :  { %2659 = vmatprep.subr.bf16.mxu0 %v2867_v17 }
0x22f2   :  { %2661 = vmatpush3.bf16.msra.mxu0 %v2974_v26 }
0x22f3   :  { %2662 = vmatprep.subr.bf16.mxu0 %v2867_v17 }
0x22f6   :  { %2664 = vmatpush3.bf16.msra.mxu0 %v2978_v29 }
0x22f7   :  { %2665 = vmatprep.subr.bf16.mxu0 %v2867_v17 }
0x22fa   :  { %2667 = vmatpush3.bf16.msra.mxu0 %v2982_v32 }
0x22fb   :  { %2668 = vmatprep.subr.bf16.mxu0 %v2867_v17 }
0x22fe   :  { %2670 = vmatpush3.bf16.msra.mxu0 %v2986_v35 }
0x22ff   :  { %2671 = vmatprep.subr.bf16.mxu0 %v2867_v17 }
0x2302   :  { %2673 = vmatpush3.bf16.msra.mxu0 %v2990_v39 }
0x23b8   :  { %v1666_v0 = vpop.f32.mrb[12].mxu0 }
0x23b9   :  { %v1668_v16 = vpop.f32.mrb[13].mxu0  ;;  %v1667_v25 = vadd.f32 %v1666_v0, %v3007_v45 }
0x23ba   :  { %v1669_v20 = vadd.f32 %v1668_v16, %v3040_v7 }
0x23bc   :  { %v1678_v23 = vrot.slane %v1669_v20, %v3042_v11  ;;  %v1698_v26 = vsel %vm371_vm3, %v1669_v20, -inf }
0x23bd   :  { %1699 = vmax.xlane.f32.xlu1 %v1698_v26 }
0x23be   :  { %v1679_v29 = vcombine.high %v1678_v23, %v1678_v23  ;;  %1994 = vst.sshfl [vmem:[#allocation7 + $0x6] sm:$0x1 pattern:$0x73625140] %v1678_v23 }
0x23c0   :  { %1995 = vst.sshfl [vmem:[#allocation7 + $0xe] sm:$0x1 pattern:$0x73625140] %v1679_v29 }
0x244a   :  { %v1700_v32 = vpop.xlane.xlu1 %1699 }
0x244b   :  { %vm1701_vm1 = vcmp.eq.f32.partialorder %v1669_v20, %v1700_v32 }
0x244c   :  { %v1702_v35 = vsel %vm1701_vm1, %v2992_v40, 128 }
0x244d   :  { %v1703_v17 = vsel %vm371_vm3, %v1702_v35, 2147483647  ;;  %vm1919_vm3 = vcmask 254976  }
0x244e   :  { %v1705_v6 = vshra.s32 %v1703_v17, 16  ;;  %v1704_v10 = vand.u32 65535, %v1703_v17 }
0x2450   :  { %v1707_v39 = vcvt.s32.f32 %v1705_v6  ;;  %v1706_v14 = vcvt.s32.f32 %v1704_v10 }
0x2452   :  { %1708 = vmin.xlane.f32.xlu0 %v1707_v39 }
0x24df   :  { %v1709_v13 = vpop.xlane.xlu0 %1708 }
0x24e0   :  { %vm1710_vm9 = vcmp.eq.f32.partialorder %v1707_v39, %v1709_v13  ;;  %v1715_v18 = vcvt.f32.s32 %v1709_v13 }
0x24e1   :  { %v1711_v15 = vsel %vm1710_vm9, %v1706_v14, inf }
0x24e2   :  { %1712 = vmin.xlane.f32.xlu0 %v1711_v15  ;;  %v1716_v21 = vshll.u32 %v1715_v18, 16 }
0x256f   :  { %v1713_v19 = vpop.xlane.xlu0 %1712 }
0x2570   :  { %v1714_v22 = vcvt.f32.s32 %v1713_v19 }
0x2572   :  { %v1717_v24 = vadd.s32 %v1716_v21, %v1714_v22 }
0x2574   :  { %vm1718_vm10 = vcmp.eq.s32.totalorder %v2992_v40, %v1717_v24 }
0x2575   :  { %2416 = vmatmul.mubr.msk.f32.vlgmr.msra.gmra.mrb[14].mxu0 %vm1718_vm10, %v2869_v41 }
0x2648   :  { %v1787_v27 = vpop.f32.mrb[14].mxu0 }
0x2649   :  { %v1791_v28 = vadd.f32 %v1787_v27, %v1667_v25  ;;  %v2417_v30 = vpop.f32.mrb[15].mxu0 }
0x264b   :  { %2756 = vtanh.f32 %v1791_v28  ;;  %v1998_v33 = vmul.f32 -1.442695, %v1791_v28 }
0x264d   :  { %2758 = vpow2.f32 %v1998_v33 }
0x2655   :  { %v2757_v31 = vpop.eup %2756 }
0x2656   :  { %1801 = vrot.lane.b32.xlu1 %v2757_v31, %s2870_s26 }
0x2657   :  { %v2759_v34 = vpop.eup %2758 }
0x2658   :  { %v1795_v36 = vadd.f32 1.0, %v2759_v34 }
0x265a   :  { %2760 = vrcp.f32 %v1795_v36 }
0x2664   :  { %v2761_v37 = vpop.eup %2760 }
0x2665   :  { %v1799_v40 = vmul.f32 %v2761_v37, %v3259_v63 }
0x26c8   :  { %v1802_v38 = vpop.permute.xlu1 %1801 }
0x26c9   :  { %v1804_v42 = vmul.f32 %v2761_v37, %v1802_v38 }
0x26cb   :  { %1806 = vrot.lane.b32.xlu0 %v1804_v42, %s2871_s29 }
0x273d   :  { %v1807_v41 = vpop.permute.xlu0 %1806 }
0x273e   :  { %v1809_v45 = vadd.f32 %v1807_v41, %v1799_v40 }
0x2740   :  { %2762 = vtanh.f32 %v1809_v45 }
0x274a   :  { %v2763_v4 = vpop.eup %2762 }
0x274b   :  { %1812 = vrot.lane.b32.xlu1 %v2763_v4, %s2870_s26 }
0x27bd   :  { %v1813_v43 = vpop.permute.xlu1 %1812 }
0x27be   :  { %v1815_v44 = vmul.f32 %v2761_v37, %v1813_v43 }
0x27c0   :  { %1817 = vrot.lane.b32.xlu1 %v1815_v44, %s2871_s29 }
0x2832   :  { %v1818_v46 = vpop.permute.xlu1 %1817 }
0x2833   :  { %1999 = vmatmul.mubr.msk.f32.vlgmr.msra.gmra.mrb[14].mxu1 %vm95_vm0, %v1818_v46  ;;  %1920 = vst.msk [vmem:[#allocation8] sm:$0x3] %vm1919_vm3, %v1818_v46 }
0x2834   :  { %2819 = shalt.err (!%p2816_p6)
}
0x2835   :  { %s2820_s11 = scalar_lea.hbm %s3331_s6, 32 }
0x2836   :  { %p2821_p7 = scmp.ne.s32.totalorder %s3331_s6, %s2820_s11  ;;  %p2824_p8 = scmp.lt.u32.totalorder %s2820_s11, %s3331_s6 }
0x2838   :  { %p2826_p9 = pnand %p2824_p8, %p2821_p7 }
0x283a   :  { %2829 = shalt.err (!%p2826_p9)
}
0x283b   :  { %1942 = dma.vmem_to_hbm [thread:$0]  %s1940_s4, 32, %s3331_s6, [#allocation9]  }
0x283c   :  { %s2874_s18 = smov [#allocation7]  }
0x283d   :  { %s1926_s19 = sshll.u32 %s2874_s18, 4  ;;  %s1927_s19 = int_to_ptr.vmem [resolvable:$true] %s1926_s19 }
0x283e   :  { %s2830_s20 = scalar_lea.vmem %s1927_s19, 256  ;;  %p2835_p11 = scmp.lt.s32.totalorder %s1927_s19, %s1927_s19 }
0x283f   :  { %p2831_p10 = scmp.ne.s32.totalorder %s1927_s19, %s2830_s20  ;;  %p2836_p12 = scmp.lt.s32.totalorder %s2830_s20, %s2830_s20 }
0x2841   :  { %p2837_p13 = por %p2836_p12, %p2835_p11 }
0x2843   :  { %p2838_p0 = pnand %p2837_p13, %p2831_p10 }
0x2906   :  { %v1887_v47 = vpop.f32.mrb[14].mxu1 }
0x2907   :  { %v1888_v48 = vpop.f32.mrb[15].mxu1 }
0x2908   :  { %v1889_v49 = vadd.f32 %v1888_v48, %v3040_v7 }
0x290a   :  { %v1898_v50 = vrot.slane %v1889_v49, %v3042_v11 }
0x290c   :  { %v1899_v51 = vcombine.high %v1898_v50, %v1898_v50  ;;  %2000 = vst.sshfl [vmem:[#allocation7 + $0x7] sm:$0x1 pattern:$0x73625140] %v1898_v50 }
0x290e   :  { %2001 = vst.sshfl [vmem:[#allocation7 + $0xf] sm:$0x1 pattern:$0x73625140] %v1899_v51 }
0x290f   :  { %2841 = shalt.err (!%p2838_p0)
}
0x2910   :  { %s2842_s21 = scalar_lea.hbm %s3330_s5, 256 }
0x2911   :  { %p2843_p1 = scmp.ne.s32.totalorder %s3330_s5, %s2842_s21  ;;  %p2846_p2 = scmp.lt.u32.totalorder %s2842_s21, %s3330_s5 }
0x2913   :  { %p2848_p3 = pnand %p2846_p2, %p2843_p1 }
0x2915   :  { %2851 = shalt.err (!%p2848_p3)
}
0x2916   :  { %1932 = dma.vmem_to_hbm [thread:$0]  %s1927_s19, 256, %s3330_s5, [#allocation4], %s2861_s7, %s2861_s7, %s2862_s8  }
0x2917   :  { %2856 = dma.done.wait [#allocation4], 256  }
0x2918   :  { %2857 = vsyncadd [#allocation4], 4294967040 }
0x2919   :  { %2858 = dma.done.wait [#allocation9], 32  }
0x291a   :  { %2859 = vsyncadd [#allocation9], 4294967264 }
0x291b   :  { %1949 = vsyncpa [#allocation3], 1 }
0x291c   :  { %1950 = vsyncpa [#allocation6], 1 }
0x291d   :  { %1951 = vsyncpa [#allocation4], 1 }
0x291e   :  { %1952 = vsyncpa [#allocation9], 1 }

</bundles_post_ra>
